<compile_context>
chip_gen: v5e
topology: v5e:2x2
jax: 0.10.0
libtpu: 0.0.40
codegen_flags: <defaults>
</compile_context>

<pallas_src>
import jax
import jax.numpy as jnp
import numpy as np
from jax import lax
from jax.experimental import pallas as pl
from jax.experimental.pallas import tpu as pltpu

# ---- small, module-consistent shapes ----------------------------------------
B, S, D = 2, 8, 32          # batch, seq_len, embed_dim
H, DH = 4, 8                # num_heads, head_dim (H * DH == D, MHA)
F = 64                      # MLP hidden dim
V = 128                     # vocab size (kept at 128 so the logits store is lane-dense)
NSEG = 8                    # number of segment ids
L = 2                       # num_layers (nn.ModuleList of deepcopies -> identical weights)
T = B * S                   # folded token count
EPS = 1e-6
ROPE_BASE = 10000.0
NEG_INF = -1e30             # finite additive mask bias


# =============================================================================
# Pallas kernel: entire decoder forward, everything VMEM-resident, no grid.
# =============================================================================
def _rms(x):
    # scale is pre-folded into the following weight matrix
    return x * lax.rsqrt(jnp.mean(x * x, axis=-1, keepdims=True) + EPS)


def decoder_seg_kernel(tok_ref, seg_ref,
                       tok_emb_ref, seg_emb_ref,
                       wqkv_ref, wo_ref,
                       cos2_ref, sin2_ref, pmat2_ref,
                       hmask_ref, bias_ref,
                       w13_ref, w2_ref,
                       wout_ref,
                       out_ref):
    f32 = jnp.float32

    # ---- embeddings: h = tok_emb[tokens] + 1 * seg_emb[segs] (one-hot matmul gather) ----
    tok_oh = jnp.where(tok_ref[...] == lax.broadcasted_iota(jnp.int32, (T, V), 1), 1.0, 0.0)
    seg_oh = jnp.where(seg_ref[...] == lax.broadcasted_iota(jnp.int32, (T, NSEG), 1), 1.0, 0.0)
    h = (jnp.dot(tok_oh, tok_emb_ref[...], preferred_element_type=f32)
         + jnp.dot(seg_oh, seg_emb_ref[...], preferred_element_type=f32))          # (T, D)

    # hoisted parameter reads (once, outside the layer loop)
    wqkv, wo = wqkv_ref[...], wo_ref[...]
    cos2, sin2, pmat2 = cos2_ref[...], sin2_ref[...], pmat2_ref[...]
    hmask, bias = hmask_ref[...], bias_ref[...]
    w13, w2, wout = w13_ref[...], w2_ref[...], wout_ref[...]

    # identical layer clones -> same weights, statically unrolled L times
    for _ in range(L):
        # ---------------- self-attention branch ----------------
        xn = _rms(h)                                                  # sa_norm scale folded
        qkv = jnp.dot(xn, wqkv, preferred_element_type=f32)          # (T, 3D); q pre-scaled
        qk, v = qkv[:, :2 * D], qkv[:, 2 * D:]

        # interleaved-pair RoPE for q and k together: one (T,2D)x(2D,2D) matmul
        qk = qk * cos2 + jnp.dot(qk, pmat2, preferred_element_type=f32) * sin2
        q, k = qk[:, :D], qk[:, D:]

        # heads -> leading batch axis of rank-3 einsums via a static head-lane mask
        qh = jnp.broadcast_to(q[None], (H, T, D))
        kh = jnp.broadcast_to(k[None], (H, T, D)) * hmask            # zero other heads' lanes
        vh = jnp.broadcast_to(v[None], (H, T, D))

        scores = jnp.einsum('htd,hsd->hts', qh, kh, preferred_element_type=f32)   # (H, T, T)
        scores = scores + bias                                        # block-causal additive mask
        scores = scores - jnp.max(scores, axis=-1, keepdims=True)
        p = jnp.exp(scores)
        p = p * pl.reciprocal(jnp.sum(p, axis=-1, keepdims=True), approx=True)
        ctx = jnp.einsum('hts,hsd->htd', p, vh, preferred_element_type=f32)        # (H, T, D)
        attn = jnp.sum(ctx * hmask, axis=0)                           # (T, D) head merge, no concat
        h = h + jnp.dot(attn, wo, preferred_element_type=f32)

        # ---------------- MLP (SwiGLU) branch ----------------
        hn = _rms(h)                                                  # mlp_norm scale folded
        gu = jnp.dot(hn, w13, preferred_element_type=f32)            # (T, 2F) fused gate|up
        g, u = gu[:, :F], gu[:, F:]
        h = h + jnp.dot(g * lax.logistic(g) * u, w2, preferred_element_type=f32)

    # ---- final norm + output projection (lane-dense (T, 128) store) ----
    out_ref[...] = jnp.dot(_rms(h), wout, preferred_element_type=f32).astype(out_ref.dtype)


# =============================================================================
# Wrapper: single gridless pallas_call, all operands whole-array in VMEM.
# =============================================================================
def transformer_decoder_seg(tokens, segs, kernel_params):
    vmem = pl.BlockSpec(memory_space=pltpu.MemorySpace.VMEM)
    args = (tokens.reshape(T, 1).astype(jnp.int32),
            segs.reshape(T, 1).astype(jnp.int32)) + tuple(kernel_params)
    logits = pl.pallas_call(
        decoder_seg_kernel,
        out_shape=jax.ShapeDtypeStruct((T, V), jnp.float32),
        in_specs=[vmem] * len(args),
        out_specs=vmem,
    )(*args)
    return logits.reshape(B, S, V)


# =============================================================================
# Parameter construction + one-time kernel-side parameter prep (plain JAX/numpy).
# =============================================================================
def rope_tables(seq_len, dh, base=ROPE_BASE):
    half = dh // 2
    theta = 1.0 / (base ** (np.arange(0, half, dtype=np.float32) * 2.0 / dh))
    pos = np.arange(seq_len, dtype=np.float32)
    ang = pos[:, None] * theta[None, :]                     # (S, half)
    cos = np.repeat(np.cos(ang), 2, axis=-1).astype(np.float32)   # (S, dh)
    sin = np.repeat(np.sin(ang), 2, axis=-1).astype(np.float32)
    p = np.zeros((dh, dh), np.float32)                      # interleaved pair-swap w/ signs
    for i in range(half):
        p[2 * i + 1, 2 * i] = -1.0
        p[2 * i, 2 * i + 1] = 1.0
    return cos, sin, p


def init_params(key):
    ks = jax.random.split(key, 13)
    w = lambda k, shp: 0.02 * jax.random.normal(k, shp, jnp.float32)
    g = lambda k: 1.0 + 0.05 * jax.random.normal(k, (1, D), jnp.float32)   # non-unit norm scales
    return dict(
        tok_emb=jax.random.normal(ks[0], (V, D), jnp.float32),
        seg_emb=jax.random.normal(ks[1], (NSEG, D), jnp.float32),
        wq=w(ks[2], (D, D)), wk=w(ks[3], (D, D)), wv=w(ks[4], (D, D)), wo=w(ks[5], (D, D)),
        w1=w(ks[6], (D, F)), w3=w(ks[7], (D, F)), w2=w(ks[8], (F, D)),
        wout=w(ks[9], (D, V)),
        sa_w=g(ks[10]), mlp_w=g(ks[11]), fin_w=g(ks[12]),
    )


def pack_kernel_params(p):
    """One-time prep: weight fusion, norm-scale + attention-scale folding, RoPE/mask tables."""
    cos, sin, pmat = rope_tables(S, DH)
    sa_scale = p["sa_w"].reshape(D, 1)
    mlp_scale = p["mlp_w"].reshape(D, 1)
    fin_scale = p["fin_w"].reshape(D, 1)
    # fused QKV with 1/sqrt(DH) folded into the q block (RoPE is linear -> exact),
    # and the sa_norm scale folded row-wise into the fused weight (diag-scale commutes).
    wqkv = sa_scale * jnp.concatenate(
        [p["wq"] * np.float32(1.0 / np.sqrt(DH)), p["wk"], p["wv"]], axis=1)       # (D, 3D)
    w13 = mlp_scale * jnp.concatenate([p["w1"], p["w3"]], axis=1)                  # (D, 2F)
    wout = fin_scale * p["wout"]                                                   # (D, V)
    # RoPE tables covering the fused q|k lanes (one rotation matmul per layer)
    cos2 = jnp.asarray(np.tile(cos, (B, 2 * H)))                                   # (T, 2D)
    sin2 = jnp.asarray(np.tile(sin, (B, 2 * H)))                                   # (T, 2D)
    pmat2 = jnp.asarray(np.kron(np.eye(2 * H, dtype=np.float32), pmat))            # (2D, 2D)
    hmask = jnp.asarray(np.repeat(np.eye(H, dtype=np.float32), DH, axis=1).reshape(H, 1, D))
    # additive block-causal bias over the folded (B*S) tokens
    pos = np.arange(T)
    same_b = (pos[:, None] // S) == (pos[None, :] // S)
    causal = (pos[None, :] % S) <= (pos[:, None] % S)
    bias = jnp.asarray(np.where(same_b & causal, 0.0, NEG_INF).astype(np.float32)[None])  # (1,T,T)
    return (p["tok_emb"], p["seg_emb"], wqkv, p["wo"],
            cos2, sin2, pmat2, hmask, bias, w13, p["w2"], wout)


# =============================================================================
# Pure-JAX reference (unfused, per-head math, unfolded norm scales) for checking.
# =============================================================================
def reference(tokens, segs, p):
    cos_np, sin_np, pmat_np = rope_tables(S, DH)
    cos, sin, pmat = jnp.asarray(cos_np), jnp.asarray(sin_np), jnp.asarray(pmat_np)

    def rmsn(x, w):
        return x * lax.rsqrt(jnp.mean(x * x, -1, keepdims=True) + EPS) * w

    def rope(t):  # (B, S, H, DH)
        return (t * cos[None, :, None, :]
                + jnp.einsum("bshd,de->bshe", t, pmat) * sin[None, :, None, :])

    h = p["tok_emb"][tokens] + 1 * p["seg_emb"][segs]        # weight = 1 in the module
    causal = jnp.tril(jnp.ones((S, S), bool))
    for _ in range(L):
        xn = rmsn(h, p["sa_w"])
        q = (xn @ p["wq"]).reshape(B, S, H, DH)
        k = (xn @ p["wk"]).reshape(B, S, H, DH)
        v = (xn @ p["wv"]).reshape(B, S, H, DH)
        q, k = rope(q), rope(k)
        sc = jnp.einsum("bqhd,bkhd->bhqk", q, k) / (DH ** 0.5)
        sc = jnp.where(causal[None, None], sc, -jnp.inf)
        attn = jnp.einsum("bhqk,bkhd->bqhd", jax.nn.softmax(sc, -1), v).reshape(B, S, D)
        h = h + attn @ p["wo"]
        hn = rmsn(h, p["mlp_w"])
        h = h + (jax.nn.silu(hn @ p["w1"]) * (hn @ p["w3"])) @ p["w2"]
    return rmsn(h, p["fin_w"]) @ p["wout"]                    # (B, S, V)


if __name__ == "__main__":
    key = jax.random.PRNGKey(0)
    kt, ksg, kp = jax.random.split(key, 3)
    tokens = jax.random.randint(kt, (B, S), 0, V, dtype=jnp.int32)
    segs = jax.random.randint(ksg, (B, S), 0, NSEG, dtype=jnp.int32)
    params = init_params(kp)
    kparams = pack_kernel_params(params)

    out = jax.block_until_ready(transformer_decoder_seg(tokens, segs, kparams))
    ref = jax.block_until_ready(reference(tokens, segs, params))
    # tolerance loosened slightly vs 1e-4 for the approx-reciprocal softmax denominator
    np.testing.assert_allclose(np.asarray(out), np.asarray(ref), rtol=5e-4, atol=5e-4)

    print("KERNEL_OK")
</pallas_src>

<mosaic_0001>
module attributes {stable_mosaic.version = 11 : i64} {
  func.func @decoder_seg_kernel(%arg0: memref<16x1xi32, #tpu.memory_space<vmem>>, %arg1: memref<16x1xi32, #tpu.memory_space<vmem>>, %arg2: memref<128x32xf32, #tpu.memory_space<vmem>>, %arg3: memref<8x32xf32, #tpu.memory_space<vmem>>, %arg4: memref<32x96xf32, #tpu.memory_space<vmem>>, %arg5: memref<32x32xf32, #tpu.memory_space<vmem>>, %arg6: memref<16x64xf32, #tpu.memory_space<vmem>>, %arg7: memref<16x64xf32, #tpu.memory_space<vmem>>, %arg8: memref<64x64xf32, #tpu.memory_space<vmem>>, %arg9: memref<4x1x32xf32, #tpu.memory_space<vmem>>, %arg10: memref<1x16x16xf32, #tpu.memory_space<vmem>>, %arg11: memref<32x128xf32, #tpu.memory_space<vmem>>, %arg12: memref<64x32xf32, #tpu.memory_space<vmem>>, %arg13: memref<32x128xf32, #tpu.memory_space<vmem>>, %arg14: memref<16x128xf32, #tpu.memory_space<vmem>>) attributes {dimension_semantics = [], scalar_prefetch = 0 : i64, scratch_operands = 0 : i64, tpu.core_type = #tpu.core_type<tc>} {
    %c0 = arith.constant 0 : index
    %c0_0 = arith.constant 0 : index
    %0 = vector.load %arg0[%c0, %c0_0] : memref<16x1xi32, #tpu.memory_space<vmem>>, vector<16x1xi32>
    %1 = tpu.iota {dimensions = array<i32: 1>} : vector<16x128xi32>
    %2 = vector.broadcast %0 : vector<16x1xi32> to vector<16x128xi32>
    %3 = arith.cmpi eq, %2, %1 : vector<16x128xi32>
    %cst = arith.constant 1.000000e+00 : f32
    %cst_1 = arith.constant 0.000000e+00 : f32
    %4 = vector.broadcast %cst : f32 to vector<16x128xf32>
    %5 = vector.broadcast %cst_1 : f32 to vector<16x128xf32>
    %6 = arith.select %3, %4, %5 : vector<16x128xi1>, vector<16x128xf32>
    %c0_2 = arith.constant 0 : index
    %c0_3 = arith.constant 0 : index
    %7 = vector.load %arg1[%c0_2, %c0_3] : memref<16x1xi32, #tpu.memory_space<vmem>>, vector<16x1xi32>
    %8 = tpu.iota {dimensions = array<i32: 1>} : vector<16x8xi32>
    %9 = vector.broadcast %7 : vector<16x1xi32> to vector<16x8xi32>
    %10 = arith.cmpi eq, %9, %8 : vector<16x8xi32>
    %cst_4 = arith.constant 1.000000e+00 : f32
    %cst_5 = arith.constant 0.000000e+00 : f32
    %11 = vector.broadcast %cst_4 : f32 to vector<16x8xf32>
    %12 = vector.broadcast %cst_5 : f32 to vector<16x8xf32>
    %13 = arith.select %10, %11, %12 : vector<16x8xi1>, vector<16x8xf32>
    %c0_6 = arith.constant 0 : index
    %c0_7 = arith.constant 0 : index
    %14 = vector.load %arg2[%c0_6, %c0_7] : memref<128x32xf32, #tpu.memory_space<vmem>>, vector<128x32xf32>
    %cst_8 = arith.constant dense<0.000000e+00> : vector<16x32xf32>
    %15 = tpu.matmul %6, %14, %cst_8 {dimension_numbers = #tpu.dot_dimension_numbers<[1], [0], [0], [1], [0, 0, 1, 1], [], []>} : vector<16x128xf32>, vector<128x32xf32>, vector<16x32xf32> -> vector<16x32xf32>
    %c0_9 = arith.constant 0 : index
    %c0_10 = arith.constant 0 : index
    %16 = vector.load %arg3[%c0_9, %c0_10] : memref<8x32xf32, #tpu.memory_space<vmem>>, vector<8x32xf32>
    %cst_11 = arith.constant dense<0.000000e+00> : vector<16x32xf32>
    %17 = tpu.matmul %13, %16, %cst_11 {dimension_numbers = #tpu.dot_dimension_numbers<[1], [0], [0], [1], [0, 0, 1, 1], [], []>} : vector<16x8xf32>, vector<8x32xf32>, vector<16x32xf32> -> vector<16x32xf32>
    %18 = arith.addf %15, %17 : vector<16x32xf32>
    %c0_12 = arith.constant 0 : index
    %c0_13 = arith.constant 0 : index
    %19 = vector.load %arg4[%c0_12, %c0_13] : memref<32x96xf32, #tpu.memory_space<vmem>>, vector<32x96xf32>
    %c0_14 = arith.constant 0 : index
    %c0_15 = arith.constant 0 : index
    %20 = vector.load %arg5[%c0_14, %c0_15] : memref<32x32xf32, #tpu.memory_space<vmem>>, vector<32x32xf32>
    %c0_16 = arith.constant 0 : index
    %c0_17 = arith.constant 0 : index
    %21 = vector.load %arg6[%c0_16, %c0_17] : memref<16x64xf32, #tpu.memory_space<vmem>>, vector<16x64xf32>
    %c0_18 = arith.constant 0 : index
    %c0_19 = arith.constant 0 : index
    %22 = vector.load %arg7[%c0_18, %c0_19] : memref<16x64xf32, #tpu.memory_space<vmem>>, vector<16x64xf32>
    %c0_20 = arith.constant 0 : index
    %c0_21 = arith.constant 0 : index
    %23 = vector.load %arg8[%c0_20, %c0_21] : memref<64x64xf32, #tpu.memory_space<vmem>>, vector<64x64xf32>
    %c0_22 = arith.constant 0 : index
    %c0_23 = arith.constant 0 : index
    %c0_24 = arith.constant 0 : index
    %24 = vector.load %arg9[%c0_22, %c0_23, %c0_24] : memref<4x1x32xf32, #tpu.memory_space<vmem>>, vector<4x1x32xf32>
    %c0_25 = arith.constant 0 : index
    %c0_26 = arith.constant 0 : index
    %c0_27 = arith.constant 0 : index
    %25 = vector.load %arg10[%c0_25, %c0_26, %c0_27] : memref<1x16x16xf32, #tpu.memory_space<vmem>>, vector<1x16x16xf32>
    %c0_28 = arith.constant 0 : index
    %c0_29 = arith.constant 0 : index
    %26 = vector.load %arg11[%c0_28, %c0_29] : memref<32x128xf32, #tpu.memory_space<vmem>>, vector<32x128xf32>
    %c0_30 = arith.constant 0 : index
    %c0_31 = arith.constant 0 : index
    %27 = vector.load %arg12[%c0_30, %c0_31] : memref<64x32xf32, #tpu.memory_space<vmem>>, vector<64x32xf32>
    %c0_32 = arith.constant 0 : index
    %c0_33 = arith.constant 0 : index
    %28 = vector.load %arg13[%c0_32, %c0_33] : memref<32x128xf32, #tpu.memory_space<vmem>>, vector<32x128xf32>
    %29 = arith.mulf %18, %18 : vector<16x32xf32>
    %cst_34 = arith.constant dense<0.000000e+00> : vector<16xf32>
    %30 = vector.multi_reduction <add>, %29, %cst_34 [1] : vector<16x32xf32> to vector<16xf32>
    %31 = vector.shape_cast %30 : vector<16xf32> to vector<16x1xf32>
    %cst_35 = arith.constant 3.200000e+01 : f32
    %32 = vector.broadcast %cst_35 : f32 to vector<16x1xf32>
    %33 = arith.divf %31, %32 : vector<16x1xf32>
    %cst_36 = arith.constant 9.99999997E-7 : f32
    %34 = vector.broadcast %cst_36 : f32 to vector<16x1xf32>
    %35 = arith.addf %33, %34 : vector<16x1xf32>
    %36 = math.rsqrt %35 : vector<16x1xf32>
    %37 = vector.broadcast %36 : vector<16x1xf32> to vector<16x32xf32>
    %38 = arith.mulf %18, %37 : vector<16x32xf32>
    %cst_37 = arith.constant dense<0.000000e+00> : vector<16x96xf32>
    %39 = tpu.matmul %38, %19, %cst_37 {dimension_numbers = #tpu.dot_dimension_numbers<[1], [0], [0], [1], [0, 0, 1, 1], [], []>} : vector<16x32xf32>, vector<32x96xf32>, vector<16x96xf32> -> vector<16x96xf32>
    %40 = vector.extract_strided_slice %39 {offsets = [0, 0], sizes = [16, 64], strides = [1, 1]} : vector<16x96xf32> to vector<16x64xf32>
    %41 = vector.extract_strided_slice %39 {offsets = [0, 64], sizes = [16, 32], strides = [1, 1]} : vector<16x96xf32> to vector<16x32xf32>
    %42 = arith.mulf %40, %21 : vector<16x64xf32>
    %cst_38 = arith.constant dense<0.000000e+00> : vector<16x64xf32>
    %43 = tpu.matmul %40, %23, %cst_38 {dimension_numbers = #tpu.dot_dimension_numbers<[1], [0], [0], [1], [0, 0, 1, 1], [], []>} : vector<16x64xf32>, vector<64x64xf32>, vector<16x64xf32> -> vector<16x64xf32>
    %44 = arith.mulf %43, %22 : vector<16x64xf32>
    %45 = arith.addf %42, %44 : vector<16x64xf32>
    %46 = vector.extract_strided_slice %45 {offsets = [0, 0], sizes = [16, 32], strides = [1, 1]} : vector<16x64xf32> to vector<16x32xf32>
    %47 = vector.extract_strided_slice %45 {offsets = [0, 32], sizes = [16, 32], strides = [1, 1]} : vector<16x64xf32> to vector<16x32xf32>
    %48 = vector.shape_cast %46 : vector<16x32xf32> to vector<1x16x32xf32>
    %49 = vector.shape_cast %48 : vector<1x16x32xf32> to vector<1x16x32xf32>
    %50 = vector.broadcast %49 : vector<1x16x32xf32> to vector<4x16x32xf32>
    %51 = vector.shape_cast %47 : vector<16x32xf32> to vector<1x16x32xf32>
    %52 = vector.shape_cast %51 : vector<1x16x32xf32> to vector<1x16x32xf32>
    %53 = vector.broadcast %52 : vector<1x16x32xf32> to vector<4x16x32xf32>
    %54 = vector.broadcast %24 : vector<4x1x32xf32> to vector<4x16x32xf32>
    %55 = arith.mulf %53, %54 : vector<4x16x32xf32>
    %56 = vector.shape_cast %41 : vector<16x32xf32> to vector<1x16x32xf32>
    %57 = vector.shape_cast %56 : vector<1x16x32xf32> to vector<1x16x32xf32>
    %58 = vector.broadcast %57 : vector<1x16x32xf32> to vector<4x16x32xf32>
    "tpu.trace_start"() <{level = 10 : i32, message = "htd,hsd->hts"}> : () -> ()
    %cst_39 = arith.constant dense<0.000000e+00> : vector<4x16x16xf32>
    %59 = tpu.matmul %50, %55, %cst_39 {dimension_numbers = #tpu.dot_dimension_numbers<[2], [2], [1], [1], [0, 0, 0, 1, 1, 1], [0], [0]>} : vector<4x16x32xf32>, vector<4x16x32xf32>, vector<4x16x16xf32> -> vector<4x16x16xf32>
    "tpu.trace_stop"() : () -> ()
    %60 = vector.broadcast %25 : vector<1x16x16xf32> to vector<4x16x16xf32>
    %61 = arith.addf %59, %60 : vector<4x16x16xf32>
    %cst_40 = arith.constant dense<0xFF800000> : vector<4x16xf32>
    %62 = vector.multi_reduction <maximumf>, %61, %cst_40 [2] : vector<4x16x16xf32> to vector<4x16xf32>
    %63 = vector.shape_cast %62 : vector<4x16xf32> to vector<4x16x1xf32>
    %64 = vector.broadcast %63 : vector<4x16x1xf32> to vector<4x16x16xf32>
    %65 = arith.subf %61, %64 : vector<4x16x16xf32>
    %66 = math.exp %65 : vector<4x16x16xf32>
    %cst_41 = arith.constant dense<0.000000e+00> : vector<4x16xf32>
    %67 = vector.multi_reduction <add>, %66, %cst_41 [2] : vector<4x16x16xf32> to vector<4x16xf32>
    %68 = vector.shape_cast %67 : vector<4x16xf32> to vector<4x16x1xf32>
    %69 = tpu.reciprocal %68 {approx = true} : vector<4x16x1xf32> -> vector<4x16x1xf32>
    %70 = vector.broadcast %69 : vector<4x16x1xf32> to vector<4x16x16xf32>
    %71 = arith.mulf %66, %70 : vector<4x16x16xf32>
    "tpu.trace_start"() <{level = 10 : i32, message = "hts,hsd->htd"}> : () -> ()
    %cst_42 = arith.constant dense<0.000000e+00> : vector<4x16x32xf32>
    %72 = tpu.matmul %71, %58, %cst_42 {dimension_numbers = #tpu.dot_dimension_numbers<[2], [1], [1], [2], [0, 0, 0, 1, 1, 2], [0], [0]>} : vector<4x16x16xf32>, vector<4x16x32xf32>, vector<4x16x32xf32> -> vector<4x16x32xf32>
    "tpu.trace_stop"() : () -> ()
    %73 = vector.broadcast %24 : vector<4x1x32xf32> to vector<4x16x32xf32>
    %74 = arith.mulf %72, %73 : vector<4x16x32xf32>
    %cst_43 = arith.constant dense<0.000000e+00> : vector<16x32xf32>
    %75 = vector.multi_reduction <add>, %74, %cst_43 [0] : vector<4x16x32xf32> to vector<16x32xf32>
    %cst_44 = arith.constant dense<0.000000e+00> : vector<16x32xf32>
    %76 = tpu.matmul %75, %20, %cst_44 {dimension_numbers = #tpu.dot_dimension_numbers<[1], [0], [0], [1], [0, 0, 1, 1], [], []>} : vector<16x32xf32>, vector<32x32xf32>, vector<16x32xf32> -> vector<16x32xf32>
    %77 = arith.addf %18, %76 : vector<16x32xf32>
    %78 = arith.mulf %77, %77 : vector<16x32xf32>
    %cst_45 = arith.constant dense<0.000000e+00> : vector<16xf32>
    %79 = vector.multi_reduction <add>, %78, %cst_45 [1] : vector<16x32xf32> to vector<16xf32>
    %80 = vector.shape_cast %79 : vector<16xf32> to vector<16x1xf32>
    %cst_46 = arith.constant 3.200000e+01 : f32
    %81 = vector.broadcast %cst_46 : f32 to vector<16x1xf32>
    %82 = arith.divf %80, %81 : vector<16x1xf32>
    %cst_47 = arith.constant 9.99999997E-7 : f32
    %83 = vector.broadcast %cst_47 : f32 to vector<16x1xf32>
    %84 = arith.addf %82, %83 : vector<16x1xf32>
    %85 = math.rsqrt %84 : vector<16x1xf32>
    %86 = vector.broadcast %85 : vector<16x1xf32> to vector<16x32xf32>
    %87 = arith.mulf %77, %86 : vector<16x32xf32>
    %cst_48 = arith.constant dense<0.000000e+00> : vector<16x128xf32>
    %88 = tpu.matmul %87, %26, %cst_48 {dimension_numbers = #tpu.dot_dimension_numbers<[1], [0], [0], [1], [0, 0, 1, 1], [], []>} : vector<16x32xf32>, vector<32x128xf32>, vector<16x128xf32> -> vector<16x128xf32>
    %89 = vector.extract_strided_slice %88 {offsets = [0, 0], sizes = [16, 64], strides = [1, 1]} : vector<16x128xf32> to vector<16x64xf32>
    %90 = vector.extract_strided_slice %88 {offsets = [0, 64], sizes = [16, 64], strides = [1, 1]} : vector<16x128xf32> to vector<16x64xf32>
    %91 = arith.negf %89 : vector<16x64xf32>
    %92 = math.exp %91 : vector<16x64xf32>
    %cst_49 = arith.constant 1.000000e+00 : f32
    %93 = vector.broadcast %cst_49 : f32 to vector<16x64xf32>
    %94 = arith.addf %93, %92 : vector<16x64xf32>
    %95 = arith.divf %93, %94 : vector<16x64xf32>
    %96 = arith.mulf %89, %95 : vector<16x64xf32>
    %97 = arith.mulf %96, %90 : vector<16x64xf32>
    %cst_50 = arith.constant dense<0.000000e+00> : vector<16x32xf32>
    %98 = tpu.matmul %97, %27, %cst_50 {dimension_numbers = #tpu.dot_dimension_numbers<[1], [0], [0], [1], [0, 0, 1, 1], [], []>} : vector<16x64xf32>, vector<64x32xf32>, vector<16x32xf32> -> vector<16x32xf32>
    %99 = arith.addf %77, %98 : vector<16x32xf32>
    %100 = arith.mulf %99, %99 : vector<16x32xf32>
    %cst_51 = arith.constant dense<0.000000e+00> : vector<16xf32>
    %101 = vector.multi_reduction <add>, %100, %cst_51 [1] : vector<16x32xf32> to vector<16xf32>
    %102 = vector.shape_cast %101 : vector<16xf32> to vector<16x1xf32>
    %cst_52 = arith.constant 3.200000e+01 : f32
    %103 = vector.broadcast %cst_52 : f32 to vector<16x1xf32>
    %104 = arith.divf %102, %103 : vector<16x1xf32>
    %cst_53 = arith.constant 9.99999997E-7 : f32
    %105 = vector.broadcast %cst_53 : f32 to vector<16x1xf32>
    %106 = arith.addf %104, %105 : vector<16x1xf32>
    %107 = math.rsqrt %106 : vector<16x1xf32>
    %108 = vector.broadcast %107 : vector<16x1xf32> to vector<16x32xf32>
    %109 = arith.mulf %99, %108 : vector<16x32xf32>
    %cst_54 = arith.constant dense<0.000000e+00> : vector<16x96xf32>
    %110 = tpu.matmul %109, %19, %cst_54 {dimension_numbers = #tpu.dot_dimension_numbers<[1], [0], [0], [1], [0, 0, 1, 1], [], []>} : vector<16x32xf32>, vector<32x96xf32>, vector<16x96xf32> -> vector<16x96xf32>
    %111 = vector.extract_strided_slice %110 {offsets = [0, 0], sizes = [16, 64], strides = [1, 1]} : vector<16x96xf32> to vector<16x64xf32>
    %112 = vector.extract_strided_slice %110 {offsets = [0, 64], sizes = [16, 32], strides = [1, 1]} : vector<16x96xf32> to vector<16x32xf32>
    %113 = arith.mulf %111, %21 : vector<16x64xf32>
    %cst_55 = arith.constant dense<0.000000e+00> : vector<16x64xf32>
    %114 = tpu.matmul %111, %23, %cst_55 {dimension_numbers = #tpu.dot_dimension_numbers<[1], [0], [0], [1], [0, 0, 1, 1], [], []>} : vector<16x64xf32>, vector<64x64xf32>, vector<16x64xf32> -> vector<16x64xf32>
    %115 = arith.mulf %114, %22 : vector<16x64xf32>
    %116 = arith.addf %113, %115 : vector<16x64xf32>
    %117 = vector.extract_strided_slice %116 {offsets = [0, 0], sizes = [16, 32], strides = [1, 1]} : vector<16x64xf32> to vector<16x32xf32>
    %118 = vector.extract_strided_slice %116 {offsets = [0, 32], sizes = [16, 32], strides = [1, 1]} : vector<16x64xf32> to vector<16x32xf32>
    %119 = vector.shape_cast %117 : vector<16x32xf32> to vector<1x16x32xf32>
    %120 = vector.shape_cast %119 : vector<1x16x32xf32> to vector<1x16x32xf32>
    %121 = vector.broadcast %120 : vector<1x16x32xf32> to vector<4x16x32xf32>
    %122 = vector.shape_cast %118 : vector<16x32xf32> to vector<1x16x32xf32>
    %123 = vector.shape_cast %122 : vector<1x16x32xf32> to vector<1x16x32xf32>
    %124 = vector.broadcast %123 : vector<1x16x32xf32> to vector<4x16x32xf32>
    %125 = vector.broadcast %24 : vector<4x1x32xf32> to vector<4x16x32xf32>
    %126 = arith.mulf %124, %125 : vector<4x16x32xf32>
    %127 = vector.shape_cast %112 : vector<16x32xf32> to vector<1x16x32xf32>
    %128 = vector.shape_cast %127 : vector<1x16x32xf32> to vector<1x16x32xf32>
    %129 = vector.broadcast %128 : vector<1x16x32xf32> to vector<4x16x32xf32>
    "tpu.trace_start"() <{level = 10 : i32, message = "htd,hsd->hts"}> : () -> ()
    %cst_56 = arith.constant dense<0.000000e+00> : vector<4x16x16xf32>
    %130 = tpu.matmul %121, %126, %cst_56 {dimension_numbers = #tpu.dot_dimension_numbers<[2], [2], [1], [1], [0, 0, 0, 1, 1, 1], [0], [0]>} : vector<4x16x32xf32>, vector<4x16x32xf32>, vector<4x16x16xf32> -> vector<4x16x16xf32>
    "tpu.trace_stop"() : () -> ()
    %131 = vector.broadcast %25 : vector<1x16x16xf32> to vector<4x16x16xf32>
    %132 = arith.addf %130, %131 : vector<4x16x16xf32>
    %cst_57 = arith.constant dense<0xFF800000> : vector<4x16xf32>
    %133 = vector.multi_reduction <maximumf>, %132, %cst_57 [2] : vector<4x16x16xf32> to vector<4x16xf32>
    %134 = vector.shape_cast %133 : vector<4x16xf32> to vector<4x16x1xf32>
    %135 = vector.broadcast %134 : vector<4x16x1xf32> to vector<4x16x16xf32>
    %136 = arith.subf %132, %135 : vector<4x16x16xf32>
    %137 = math.exp %136 : vector<4x16x16xf32>
    %cst_58 = arith.constant dense<0.000000e+00> : vector<4x16xf32>
    %138 = vector.multi_reduction <add>, %137, %cst_58 [2] : vector<4x16x16xf32> to vector<4x16xf32>
    %139 = vector.shape_cast %138 : vector<4x16xf32> to vector<4x16x1xf32>
    %140 = tpu.reciprocal %139 {approx = true} : vector<4x16x1xf32> -> vector<4x16x1xf32>
    %141 = vector.broadcast %140 : vector<4x16x1xf32> to vector<4x16x16xf32>
    %142 = arith.mulf %137, %141 : vector<4x16x16xf32>
    "tpu.trace_start"() <{level = 10 : i32, message = "hts,hsd->htd"}> : () -> ()
    %cst_59 = arith.constant dense<0.000000e+00> : vector<4x16x32xf32>
    %143 = tpu.matmul %142, %129, %cst_59 {dimension_numbers = #tpu.dot_dimension_numbers<[2], [1], [1], [2], [0, 0, 0, 1, 1, 2], [0], [0]>} : vector<4x16x16xf32>, vector<4x16x32xf32>, vector<4x16x32xf32> -> vector<4x16x32xf32>
    "tpu.trace_stop"() : () -> ()
    %144 = vector.broadcast %24 : vector<4x1x32xf32> to vector<4x16x32xf32>
    %145 = arith.mulf %143, %144 : vector<4x16x32xf32>
    %cst_60 = arith.constant dense<0.000000e+00> : vector<16x32xf32>
    %146 = vector.multi_reduction <add>, %145, %cst_60 [0] : vector<4x16x32xf32> to vector<16x32xf32>
    %cst_61 = arith.constant dense<0.000000e+00> : vector<16x32xf32>
    %147 = tpu.matmul %146, %20, %cst_61 {dimension_numbers = #tpu.dot_dimension_numbers<[1], [0], [0], [1], [0, 0, 1, 1], [], []>} : vector<16x32xf32>, vector<32x32xf32>, vector<16x32xf32> -> vector<16x32xf32>
    %148 = arith.addf %99, %147 : vector<16x32xf32>
    %149 = arith.mulf %148, %148 : vector<16x32xf32>
    %cst_62 = arith.constant dense<0.000000e+00> : vector<16xf32>
    %150 = vector.multi_reduction <add>, %149, %cst_62 [1] : vector<16x32xf32> to vector<16xf32>
    %151 = vector.shape_cast %150 : vector<16xf32> to vector<16x1xf32>
    %cst_63 = arith.constant 3.200000e+01 : f32
    %152 = vector.broadcast %cst_63 : f32 to vector<16x1xf32>
    %153 = arith.divf %151, %152 : vector<16x1xf32>
    %cst_64 = arith.constant 9.99999997E-7 : f32
    %154 = vector.broadcast %cst_64 : f32 to vector<16x1xf32>
    %155 = arith.addf %153, %154 : vector<16x1xf32>
    %156 = math.rsqrt %155 : vector<16x1xf32>
    %157 = vector.broadcast %156 : vector<16x1xf32> to vector<16x32xf32>
    %158 = arith.mulf %148, %157 : vector<16x32xf32>
    %cst_65 = arith.constant dense<0.000000e+00> : vector<16x128xf32>
    %159 = tpu.matmul %158, %26, %cst_65 {dimension_numbers = #tpu.dot_dimension_numbers<[1], [0], [0], [1], [0, 0, 1, 1], [], []>} : vector<16x32xf32>, vector<32x128xf32>, vector<16x128xf32> -> vector<16x128xf32>
    %160 = vector.extract_strided_slice %159 {offsets = [0, 0], sizes = [16, 64], strides = [1, 1]} : vector<16x128xf32> to vector<16x64xf32>
    %161 = vector.extract_strided_slice %159 {offsets = [0, 64], sizes = [16, 64], strides = [1, 1]} : vector<16x128xf32> to vector<16x64xf32>
    %162 = arith.negf %160 : vector<16x64xf32>
    %163 = math.exp %162 : vector<16x64xf32>
    %cst_66 = arith.constant 1.000000e+00 : f32
    %164 = vector.broadcast %cst_66 : f32 to vector<16x64xf32>
    %165 = arith.addf %164, %163 : vector<16x64xf32>
    %166 = arith.divf %164, %165 : vector<16x64xf32>
    %167 = arith.mulf %160, %166 : vector<16x64xf32>
    %168 = arith.mulf %167, %161 : vector<16x64xf32>
    %cst_67 = arith.constant dense<0.000000e+00> : vector<16x32xf32>
    %169 = tpu.matmul %168, %27, %cst_67 {dimension_numbers = #tpu.dot_dimension_numbers<[1], [0], [0], [1], [0, 0, 1, 1], [], []>} : vector<16x64xf32>, vector<64x32xf32>, vector<16x32xf32> -> vector<16x32xf32>
    %170 = arith.addf %148, %169 : vector<16x32xf32>
    %171 = arith.mulf %170, %170 : vector<16x32xf32>
    %cst_68 = arith.constant dense<0.000000e+00> : vector<16xf32>
    %172 = vector.multi_reduction <add>, %171, %cst_68 [1] : vector<16x32xf32> to vector<16xf32>
    %173 = vector.shape_cast %172 : vector<16xf32> to vector<16x1xf32>
    %cst_69 = arith.constant 3.200000e+01 : f32
    %174 = vector.broadcast %cst_69 : f32 to vector<16x1xf32>
    %175 = arith.divf %173, %174 : vector<16x1xf32>
    %cst_70 = arith.constant 9.99999997E-7 : f32
    %176 = vector.broadcast %cst_70 : f32 to vector<16x1xf32>
    %177 = arith.addf %175, %176 : vector<16x1xf32>
    %178 = math.rsqrt %177 : vector<16x1xf32>
    %179 = vector.broadcast %178 : vector<16x1xf32> to vector<16x32xf32>
    %180 = arith.mulf %170, %179 : vector<16x32xf32>
    %cst_71 = arith.constant dense<0.000000e+00> : vector<16x128xf32>
    %181 = tpu.matmul %180, %28, %cst_71 {dimension_numbers = #tpu.dot_dimension_numbers<[1], [0], [0], [1], [0, 0, 1, 1], [], []>} : vector<16x32xf32>, vector<32x128xf32>, vector<16x128xf32> -> vector<16x128xf32>
    %c0_72 = arith.constant 0 : index
    %c0_73 = arith.constant 0 : index
    %182 = vector.load %arg14[%c0_72, %c0_73] : memref<16x128xf32, #tpu.memory_space<vmem>>, vector<16x128xf32>
    tpu.vector_store %arg14[%c0_72, %c0_73], %181 {strides = array<i32>} : memref<16x128xf32, #tpu.memory_space<vmem>>, vector<16x128xf32>,
    return
  }
}

</mosaic_0001>

<bundles_post_ra>
// kernel: tpu_custom_call.1
= control target key start
LH: loop header
LB: loop body
LE: loop exit
PB: predicated region body
PF: predicated region fallthrough
CT: control target
= control target key end

     0   :  { %19 = vsyncpa [#allocation3], 0  ;;  %s2624_s0 = inlined_call_operand.vmem [shape: s32[16,1], index: 0, kind: input, shape index: {}]   ;;  %s2625_s1 = inlined_call_operand.vmem [shape: s32[16,1], index: 1, kind: input, shape index: {}]   ;;  %s2626_s2 = inlined_call_operand.vmem [shape: f32[128,32], index: 2, kind: input, shape index: {}]   ;;  %s2627_s3 = inlined_call_operand.vmem [shape: f32[8,32], index: 3, kind: input, shape index: {}]   ;;  %s2628_s4 = inlined_call_operand.vmem [shape: f32[32,96], index: 4, kind: input, shape index: {}]   ;;  %s2629_s5 = inlined_call_operand.vmem [shape: f32[32,32], index: 5, kind: input, shape index: {}]   ;;  %s2630_s6 = inlined_call_operand.vmem [shape: f32[16,64], index: 6, kind: input, shape index: {}]   ;;  %s2631_s7 = inlined_call_operand.vmem [shape: f32[16,64], index: 7, kind: input, shape index: {}]   ;;  %s2632_s8 = inlined_call_operand.vmem [shape: f32[64,64], index: 8, kind: input, shape index: {}]   ;;  %s2633_s9 = inlined_call_operand.vmem [shape: f32[4,1,32], index: 9, kind: input, shape index: {}]   ;;  %s2634_s10 = inlined_call_operand.hbm [shape: f32[1,16,16], index: 10, kind: input, shape index: {}]   ;;  %s2635_s11 = inlined_call_operand.vmem [shape: f32[32,128], index: 11, kind: input, shape index: {}]   ;;  %s2636_s12 = inlined_call_operand.vmem [shape: f32[64,32], index: 12, kind: input, shape index: {}]   ;;  %s2637_s13 = inlined_call_operand.vmem [shape: f32[32,128], index: 13, kind: input, shape index: {}]   ;;  %s2638_s14 = inlined_call_operand.hbm [shape: f32[16,128], index: 14, kind: output, shape index: {}]  }
   0x1   :  { %20 = vsyncpa [#allocation4], 0  ;;  %s45_s15 = sshll.u32 %s2634_s10, 4  ;;  %s1885_s16 = smov [#allocation2]   ;;  %s46_s15 = int_to_ptr.hbm [resolvable:$true] %s45_s15 }
   0x2   :  { %s47_s17 = sshll.u32 %s1885_s16, 4  ;;  %s1886_s18 = smov 128   ;;  %s48_s17 = int_to_ptr.vmem [resolvable:$true] %s47_s17 }
   0x3   :  { %s1887_s19 = smov 8  }
   0x4   :  { %53 = dma.hbm_to_vmem [thread:$0]  %s46_s15, 256, %s48_s17, [#allocation3], %s1886_s18, %s1886_s18, %s1887_s19  }
   0x5   :  { %1881 = dma.done.wait [#allocation3], 256  }
   0x6   :  { %1882 = vsyncadd [#allocation3], 4294967040  ;;  %v1888_v0 = vmov 0   ;;  %v79_v1 = vld [vmem:[%s2625_s1 + $0x8] sm:$0xff]  ;;  %v78_v2 = vld [vmem:[%s2625_s1] sm:$0xff]  ;;  %v66_v22 = vlaneseq  ;;  %vm107_vm0 = vcmask 64512  }
   0x7   :  { %1712 = vset.pattern.permute.xlu1 %v1888_v0  ;;  %1711 = vset.pattern.permute.xlu0 %v1888_v0  ;;  %v105_v3 = vld [vmem:[%s2626_s2 + $0x78] sm:$0xff]  ;;  %v104_v4 = vld [vmem:[%s2626_s2 + $0x70] sm:$0xff]  ;;  %v103_v5 = vld [vmem:[%s2626_s2 + $0x68] sm:$0xff]  ;;  %v1889_v25 = vmov 0.0   ;;  %v1890_v30 = vmov 1.0   ;;  %vm204_vm5 = vcmask 261120  }
   0x8   :  { %84 = vperm.xlu1 %1712, %v79_v1   ;;  %81 = vperm.xlu0 %1711, %v78_v2   ;;  %v102_v6 = vld [vmem:[%s2626_s2 + $0x60] sm:$0xff]  ;;  %v65_v7 = vld [vmem:[%s2624_s0 + $0x8] sm:$0xff]  ;;  %v101_v9 = vld [vmem:[%s2626_s2 + $0x58] sm:$0xff]  ;;  %v67_v23 = vand.u32 127, %v66_v22  ;;  %v1891_v42 = vmov 32.0   ;;  %s1892_s20 = smov 32  }
   0x9   :  { %137 = vmatpush.msra.mxu1 %v105_v3  ;;  %v64_v8 = vld [vmem:[%s2624_s0] sm:$0xff]  ;;  %v100_v10 = vld [vmem:[%s2626_s2 + $0x50] sm:$0xff]  ;;  %v99_v11 = vld [vmem:[%s2626_s2 + $0x48] sm:$0xff]  ;;  %1727 = vrcp.f32 %v1891_v42  ;;  %vm275_vm13 = vcmask 523264   ;;  %vm479_vm14 = vcmask 130048  }
   0xa   :  { %v98_v12 = vld [vmem:[%s2626_s2 + $0x40] sm:$0xff]  ;;  %v97_v13 = vld [vmem:[%s2626_s2 + $0x38] sm:$0xff]  ;;  %v96_v14 = vld [vmem:[%s2626_s2 + $0x30] sm:$0xff] }
   0xb   :  { %138 = vmatpush.msra.mxu1 %v104_v4  ;;  %v95_v15 = vld [vmem:[%s2626_s2 + $0x28] sm:$0xff]  ;;  %v94_v16 = vld [vmem:[%s2626_s2 + $0x20] sm:$0xff]  ;;  %v93_v18 = vld [vmem:[%s2626_s2 + $0x18] sm:$0xff] }
   0xc   :  { %v106_v17 = vld [vmem:[%s2627_s3] sm:$0xff]  ;;  %v92_v19 = vld [vmem:[%s2626_s2 + $0x10] sm:$0xff]  ;;  %v91_v20 = vld [vmem:[%s2626_s2 + $0x8] sm:$0xff]  ;;  %s1609_s3 = sshll.u32 %s2638_s14, 4  ;;  %s1610_s3 = int_to_ptr.hbm [resolvable:$true] %s1609_s3 }
   0xd   :  { %139 = vmatpush.msra.mxu1 %v103_v5  ;;  %129 = vmatpush.msra.mxu0 %v106_v17  ;;  %v90_v21 = vld [vmem:[%s2626_s2] sm:$0xff]  ;;  %v2053_v45 = vld [vmem:[%s2628_s4 + $0x18] sm:$0xff]  ;;  %v2059_v47 = vld [vmem:[%s2628_s4 + $0x10] sm:$0xff]  ;;  %s1893_s2 = smov 96  }
   0xe   :  { %262 = vmatpush.msra.mxu2 %v2053_v45  ;;  %v2065_v48 = vld [vmem:[%s2628_s4 + $0x8] sm:$0xff]  ;;  %v2071_v50 = vld [vmem:[%s2628_s4] sm:$0xff]  ;;  %v2080_v55 = vld [vmem:[%s2632_s8 + $0x38] sm:$0xff] }
   0xf   :  { %140 = vmatpush.msra.mxu1 %v102_v6  ;;  %v1728_v43 = vpop.eup %1727  ;;  %v2085_v56 = vld [vmem:[%s2632_s8 + $0x30] sm:$0xff]  ;;  %290 = vmatpush.msra.mxu3 %v2080_v55  ;;  %v2091_v58 = vld [vmem:[%s2632_s8 + $0x28] sm:$0xff]  ;;  %v2097_v59 = vld [vmem:[%s2632_s8 + $0x20] sm:$0xff] }
  0x10   :  { %72 = vperm.xlu1 %1712, %v65_v7   ;;  %69 = vperm.xlu0 %1711, %v64_v8   ;;  %v212_v44 = vmul.f32 32.0, %v1728_v43  ;;  %vm216_vm6 = vweird.f32 %v1728_v43  ;;  %v2103_v60 = vld [vmem:[%s2632_s8 + $0x18] sm:$0xff]  ;;  %v2110_v63 = vld [vmem:[%s2632_s8 + $0x10] sm:$0xff]  ;;  %v2116_v2 = vld [vmem:[%s2632_s8 + $0x8] sm:$0xff] }
  0x11   :  { %141 = vmatpush.msra.mxu1 %v101_v9  ;;  %263 = vmatpush.msra.mxu2 %v2059_v47  ;;  %v2151_v22 = vld [vmem:[%s2633_s9 + $0x3] ss:$0 sm:$0xff] }
  0x12   :  { %v213_v46 = vsub.f32 1.0, %v212_v44  ;;  %291 = vmatpush.msra.mxu3 %v2085_v56 }
  0x13   :  { %142 = vmatpush.msra.mxu1 %v100_v10  ;;  %264 = vmatpush.msra.mxu2 %v2065_v48 }
  0x14   :  { %v214_v49 = vmul.f32 %v1728_v43, %v213_v46  ;;  %292 = vmatpush.msra.mxu3 %v2091_v58 }
  0x15   :  { %143 = vmatpush.msra.mxu1 %v99_v11  ;;  %265 = vmatpush.msra.mxu2 %v2071_v50 }
  0x16   :  { %v215_v51 = vadd.f32 %v1728_v43, %v214_v49  ;;  %293 = vmatpush.msra.mxu3 %v2097_v59 }
  0x17   :  { %144 = vmatpush.msra.mxu1 %v98_v12 }
  0x18   :  { %v2074_v52 = vsel %vm216_vm6, %v1728_v43, %v215_v51  ;;  %294 = vmatpush.msra.mxu3 %v2103_v60 }
  0x19   :  { %145 = vmatpush.msra.mxu1 %v97_v13 }
  0x1a   :  { %295 = vmatpush.msra.mxu3 %v2110_v63 }
  0x1b   :  { %146 = vmatpush.msra.mxu1 %v96_v14 }
  0x1c   :  { %296 = vmatpush.msra.mxu3 %v2116_v2 }
  0x1d   :  { %147 = vmatpush.msra.mxu1 %v95_v15 }
  0x1f   :  { %148 = vmatpush.msra.mxu1 %v94_v16 }
  0x21   :  { %149 = vmatpush.msra.mxu1 %v93_v18  ;;  %v2127_v18 = vld [vmem:[%s2632_s8] sm:$0xff] }
  0x22   :  { %297 = vmatpush.msra.mxu3 %v2127_v18 }
  0x23   :  { %150 = vmatpush.msra.mxu1 %v92_v19  ;;  %v2133_v19 = vld [vmem:[%s2633_s9] ss:$0 sm:$0xff] }
  0x24   :  { %321 = vrot.lane.b32.xlu0 %v2133_v19, %s1892_s20 }
  0x25   :  { %151 = vmatpush.msra.mxu1 %v91_v20  ;;  %v2138_v20 = vld [vmem:[%s2633_s9 + $0x2] ss:$0 sm:$0xff] }
  0x26   :  { %325 = vrot.lane.b32.xlu1 %v2138_v20, %s1892_s20 }
  0x27   :  { %152 = vmatpush.msra.mxu1 %v90_v21  ;;  %v2143_v21 = vld [vmem:[%s2633_s9 + $0x1] ss:$0 sm:$0xff] }
  0x2c   :  { %327 = vrot.lane.b32.xlu0 %v2151_v22, %s1892_s20 }
  0x7a   :  { %v82_v24 = vpop.permute.xlu0 %81  ;;  %v85_v27 = vpop.permute.xlu1 %84 }
  0x7b   :  { %vm86_vm1 = vcmp.eq.s32.totalorder %v82_v24, %v67_v23  ;;  %vm87_vm2 = vcmp.eq.s32.totalorder %v85_v27, %v67_v23 }
  0x7c   :  { %v88_v26 = vsel %vm86_vm1, 1.0, %v1889_v25  ;;  %v89_v28 = vsel %vm87_vm2, 1.0, %v1889_v25  ;;  %v2165_v25 = vld [vmem:[%s2630_s6] sm:$0xff] }
  0x7d   :  { %1622 = vmatmul.msk.f32.vlgmr.msra.gmra.mxu0 %vm107_vm0, %v88_v26  ;;  %v2170_v26 = vld [vmem:[%s2631_s7] sm:$0xff] }
  0x82   :  { %v70_v29 = vpop.permute.xlu0 %69  ;;  %v73_v31 = vpop.permute.xlu1 %72 }
  0x83   :  { %vm74_vm3 = vcmp.eq.s32.totalorder %v70_v29, %v67_v23  ;;  %vm75_vm4 = vcmp.eq.s32.totalorder %v73_v31, %v67_v23 }
  0x84   :  { %1624 = vmatmul.msk.f32.vlgmr.msra.gmra.mxu1 %vm74_vm3, %v1890_v30 }
  0x85   :  { %1623 = vmatmul.msk.f32.gmra.mxu0 %vm107_vm0, %v89_v28 }
  0x8c   :  { %1625 = vmatmul.msk.f32.gmra.mxu1 %vm75_vm4, %v1890_v30 }
  0x98   :  { %v2196_v43 = vpop.permute.xlu1 %325 }
  0xfa   :  { %v131_v32 = vpop.f32.mrf.mxu0 }
 0x101   :  { %v154_v33 = vpop.f32.mrf.mxu1 }
 0x102   :  { %v2040_v34 = vadd.f32 %v154_v33, %v131_v32  ;;  %v134_v37 = vpop.f32.mrf.mxu0  ;;  %v2177_v32 = vpop.permute.xlu0 %321 }
 0x104   :  { %v202_v35 = vmul.f32 %v2040_v34, %v2040_v34 }
 0x106   :  { %v205_v36 = vsel %vm204_vm5, %v202_v35, 0.0 }
 0x107   :  { %206 = vadd.xlane.f32.xlu2 %v205_v36  ;;  %v2184_v36 = vld [vmem:[%s2630_s6 + $0x8] sm:$0xff]  ;;  %s1894_s6 = smov 64  }
 0x109   :  { %v157_v38 = vpop.f32.mrf.mxu1 }
 0x10a   :  { %v2045_v39 = vadd.f32 %v157_v38, %v134_v37  ;;  %v2189_v37 = vld [vmem:[%s2631_s7 + $0x8] sm:$0xff] }
 0x10c   :  { %v203_v40 = vmul.f32 %v2045_v39, %v2045_v39 }
 0x10e   :  { %v208_v41 = vsel %vm204_vm5, %v203_v40, 0.0 }
 0x10f   :  { %209 = vadd.xlane.f32.xlu2 %v208_v41 }
 0x127   :  { %323 = vrot.lane.b32.xlu2 %v2143_v21, %s1892_s20 }
 0x17a   :  { %v207_v53 = vpop.xlane.xlu2 %206 }
 0x17b   :  { %v218_v54 = vmul.f32 %v2074_v52, %v207_v53  ;;  %v2206_v53 = vpop.permute.xlu0 %327 }
 0x17d   :  { %v220_v57 = vadd.f32 1e-06, %v218_v54 }
 0x17f   :  { %1729 = vrsqrt.f32 %v220_v57  ;;  %vm228_vm8 = vweird.f32 %v220_v57 }
 0x182   :  { %v210_v61 = vpop.xlane.xlu2 %209 }
 0x183   :  { %v219_v62 = vmul.f32 %v2074_v52, %v210_v61 }
 0x185   :  { %v1730_v0 = vpop.eup %1729  ;;  %v221_v1 = vadd.f32 1e-06, %v219_v62 }
 0x186   :  { %v223_v3 = vmul.f32 %v1730_v0, %v220_v57  ;;  %vm229_vm7 = vweird.f32 %v1730_v0 }
 0x187   :  { %1731 = vrsqrt.f32 %v221_v1  ;;  %vm230_vm9 = vmor %vm228_vm8, %vm229_vm7  ;;  %vm238_vm11 = vweird.f32 %v221_v1 }
 0x188   :  { %v224_v4 = vmul.f32 %v1730_v0, %v223_v3 }
 0x18a   :  { %v225_v5 = vmul.f32 0.5, %v224_v4  ;;  %v2175_v30 = vpop.permute.xlu2 %323 }
 0x18c   :  { %v226_v6 = vsub.f32 1.5, %v225_v5 }
 0x18d   :  { %v1732_v7 = vpop.eup %1731 }
 0x18e   :  { %v233_v8 = vmul.f32 %v1732_v7, %v221_v1  ;;  %v227_v9 = vmul.f32 %v1730_v0, %v226_v6  ;;  %vm239_vm10 = vweird.f32 %v1732_v7 }
 0x18f   :  { %vm240_vm12 = vmor %vm238_vm11, %vm239_vm10 }
 0x190   :  { %v234_v10 = vmul.f32 %v1732_v7, %v233_v8  ;;  %v231_v11 = vsel %vm230_vm9, %v1730_v0, %v227_v9 }
 0x191   :  { %v242_v12 = vmul.f32 %v231_v11, %v2040_v34  ;;  %v2232_v11 = vld [vmem:[#allocation2 + $0x8] sm:$0xff] }
 0x192   :  { %v235_v13 = vmul.f32 0.5, %v234_v10 }
 0x193   :  { %1626 = vmatmul.msk.f32.vlgmr.msra.gmra.mxu2 %vm204_vm5, %v242_v12 }
 0x194   :  { %v236_v14 = vsub.f32 1.5, %v235_v13 }
 0x196   :  { %v237_v15 = vmul.f32 %v1732_v7, %v236_v14 }
 0x198   :  { %v241_v16 = vsel %vm240_vm12, %v1732_v7, %v237_v15  ;;  %v2228_v7 = vld [vmem:[#allocation2] sm:$0xff] }
 0x199   :  { %v243_v17 = vmul.f32 %v241_v16, %v2045_v39 }
 0x19b   :  { %1627 = vmatmul.msk.f32.gmra.mxu2 %vm204_vm5, %v243_v17 }
 0x216   :  { %v2154_v23 = vpop.f32.mrf.mxu2 }
 0x217   :  { %1628 = vmatmul.msk.f32.vlgmr.msra.gmra.mxu3 %vm275_vm13, %v2154_v23  ;;  %v273_v28 = vmul.f32 %v2154_v23, %v2165_v25 }
 0x21e   :  { %v2158_v24 = vpop.f32.mrf.mxu2 }
 0x21f   :  { %1629 = vmatmul.msk.f32.gmra.mxu3 %vm275_vm13, %v2158_v24  ;;  %v274_v40 = vmul.f32 %v2158_v24, %v2184_v36 }
 0x29a   :  { %v299_v27 = vpop.f32.mrf.mxu3 }
 0x29b   :  { %v305_v29 = vmul.f32 %v299_v27, %v2170_v26 }
 0x29d   :  { %v307_v31 = vadd.f32 %v305_v29, %v273_v28 }
 0x29f   :  { %v335_v33 = vmul.f32 %v2175_v30, %v307_v31  ;;  %v333_v35 = vmul.f32 %v2177_v32, %v307_v31  ;;  %v337_v51 = vmul.f32 %v2196_v43, %v307_v31  ;;  %v339_v57 = vmul.f32 %v2206_v53, %v307_v31 }
 0x2a1   :  { %382 = vrot.lane.b32.xlu2 %v335_v33, %s1893_s2  ;;  %343 = vrot.lane.b32.xlu1 %v333_v35, %s1893_s2 }
 0x2a2   :  { %v302_v38 = vpop.f32.mrf.mxu3 }
 0x2a3   :  { %v306_v41 = vmul.f32 %v302_v38, %v2189_v37 }
 0x2a5   :  { %v308_v42 = vadd.f32 %v306_v41, %v274_v40 }
 0x2a7   :  { %v338_v44 = vmul.f32 %v2196_v43, %v308_v42  ;;  %v334_v46 = vmul.f32 %v2177_v32, %v308_v42  ;;  %v336_v49 = vmul.f32 %v2175_v30, %v308_v42  ;;  %v340_v54 = vmul.f32 %v2206_v53, %v308_v42 }
 0x2a9   :  { %417 = vrot.lane.b32.xlu0 %v338_v44, %s1893_s2  ;;  %345 = vrot.lane.b32.xlu1 %v334_v46, %s1893_s2 }
 0x2b1   :  { %384 = vrot.lane.b32.xlu0 %v336_v49, %s1893_s2  ;;  %415 = vrot.lane.b32.xlu1 %v337_v51, %s1893_s2 }
 0x2b9   :  { %450 = vrot.lane.b32.xlu0 %v340_v54, %s1893_s2  ;;  %448 = vrot.lane.b32.xlu1 %v339_v57, %s1893_s2 }
 0x2fb   :  { %v383_v4 = vpop.permute.xlu2 %382 }
 0x313   :  { %v344_v61 = vpop.permute.xlu1 %343 }
 0x31b   :  { %v346_v62 = vpop.permute.xlu1 %345  ;;  %v418_v0 = vpop.permute.xlu0 %417 }
 0x31c   :  { %1630 = vmatpush.xpose.msk.msrb.mxu0 %vm204_vm5, %v346_v62  ;;  %1638 = vmatpush.xpose.msk.msrb.mxu3 %vm204_vm5, %v418_v0 }
 0x320   :  { %1631 = vmatpush.xpose.msk.msrb.mxu0 %vm204_vm5, %v344_v61 }
 0x323   :  { %1632 = vmatmul.msk.f32.vlgmr.msrb.gmra.mxu0 %vm204_vm5, %v307_v31  ;;  %v416_v1 = vpop.permute.xlu1 %415  ;;  %v385_v3 = vpop.permute.xlu0 %384 }
 0x324   :  { %1634 = vmatpush.xpose.msk.msrb.mxu2 %vm204_vm5, %v385_v3  ;;  %1639 = vmatpush.xpose.msk.msrb.mxu3 %vm204_vm5, %v416_v1 }
 0x327   :  { %1640 = vmatmul.msk.f32.vlgmr.msrb.gmra.mxu3 %vm204_vm5, %v307_v31 }
 0x328   :  { %1635 = vmatpush.xpose.msk.msrb.mxu2 %vm204_vm5, %v383_v4 }
 0x32b   :  { %1633 = vmatmul.msk.f32.gmra.mxu0 %vm204_vm5, %v308_v42  ;;  %1636 = vmatmul.msk.f32.vlgmr.msrb.gmra.mxu2 %vm204_vm5, %v307_v31  ;;  %v451_v5 = vpop.permute.xlu0 %450  ;;  %v449_v6 = vpop.permute.xlu1 %448 }
 0x32c   :  { %1642 = vmatpush.xpose.msk.msra.mxu0 %vm204_vm5, %v451_v5 }
 0x32f   :  { %1641 = vmatmul.msk.f32.gmra.mxu3 %vm204_vm5, %v308_v42 }
 0x330   :  { %1643 = vmatpush.xpose.msk.msra.mxu0 %vm204_vm5, %v449_v6 }
 0x333   :  { %1637 = vmatmul.msk.f32.gmra.mxu2 %vm204_vm5, %v308_v42  ;;  %1644 = vmatmul.msk.f32.vlgmr.msra.gmra.mxu0 %vm204_vm5, %v307_v31 }
 0x33b   :  { %1645 = vmatmul.msk.f32.gmra.mxu0 %vm204_vm5, %v308_v42 }
 0x3a0   :  { %v374_v8 = vpop.f32.mrf.mxu0 }
 0x3a1   :  { %v375_v9 = vadd.f32 %v374_v8, %v2228_v7 }
 0x3a3   :  { %v480_v10 = vsel %vm479_vm14, %v375_v9, -inf }
 0x3a4   :  { %481 = vmax.xlane.f32.xlu2 %v480_v10 }
 0x3a8   :  { %v377_v12 = vpop.f32.mrf.mxu0 }
 0x3a9   :  { %v378_v13 = vadd.f32 %v377_v12, %v2232_v11 }
 0x3aa   :  { %v440_v14 = vpop.f32.mrf.mxu3 }
 0x3ab   :  { %v441_v15 = vadd.f32 %v440_v14, %v2228_v7  ;;  %v483_v16 = vsel %vm479_vm14, %v378_v13, -inf }
 0x3ac   :  { %484 = vmax.xlane.f32.xlu2 %v483_v16 }
 0x3ad   :  { %v492_v17 = vsel %vm479_vm14, %v441_v15, -inf }
 0x3ae   :  { %493 = vmax.xlane.f32.xlu0 %v492_v17  ;;  %v407_v27 = vpop.f32.mrf.mxu2 }
 0x3af   :  { %v408_v28 = vadd.f32 %v407_v27, %v2228_v7 }
 0x3b0   :  { %v473_v29 = vpop.f32.mrf.mxu0 }
 0x3b1   :  { %v474_v31 = vadd.f32 %v473_v29, %v2228_v7  ;;  %v486_v33 = vsel %vm479_vm14, %v408_v28, -inf }
 0x3b2   :  { %v443_v35 = vpop.f32.mrf.mxu3  ;;  %487 = vmax.xlane.f32.xlu1 %v486_v33 }
 0x3b3   :  { %v444_v38 = vadd.f32 %v443_v35, %v2232_v11  ;;  %v498_v41 = vsel %vm479_vm14, %v474_v31, -inf }
 0x3b5   :  { %v495_v40 = vsel %vm479_vm14, %v444_v38, -inf }
 0x3b6   :  { %496 = vmax.xlane.f32.xlu2 %v495_v40  ;;  %v410_v42 = vpop.f32.mrf.mxu2  ;;  %499 = vmax.xlane.f32.xlu0 %v498_v41 }
 0x3b7   :  { %v411_v44 = vadd.f32 %v410_v42, %v2232_v11 }
 0x3b8   :  { %v476_v46 = vpop.f32.mrf.mxu0 }
 0x3b9   :  { %v477_v49 = vadd.f32 %v476_v46, %v2232_v11  ;;  %v489_v51 = vsel %vm479_vm14, %v411_v44, -inf }
 0x3ba   :  { %490 = vmax.xlane.f32.xlu1 %v489_v51 }
 0x3bb   :  { %v501_v54 = vsel %vm479_vm14, %v477_v49, -inf }
 0x3be   :  { %502 = vmax.xlane.f32.xlu2 %v501_v54 }
 0x417   :  { %v482_v57 = vpop.xlane.xlu2 %481 }
 0x418   :  { %v504_v61 = vsub.f32 %v375_v9, %v482_v57 }
 0x41a   :  { %v512_v62 = vmul.f32 1.442695, %v504_v61  ;;  %v1713_v61 = vpack.i.bf16 %v2154_v23, %v2158_v24 }
 0x41c   :  { %1733 = vpow2.f32 %v512_v62 }
 0x41f   :  { %v485_v0 = vpop.xlane.xlu2 %484 }
 0x420   :  { %v505_v6 = vsub.f32 %v378_v13, %v485_v0 }
 0x421   :  { %v494_v1 = vpop.xlane.xlu0 %493 }
 0x422   :  { %v2248_v3 = vpop.eup %1733  ;;  %v508_v4 = vsub.f32 %v441_v15, %v494_v1  ;;  %v514_v14 = vmul.f32 1.442695, %v505_v6 }
 0x423   :  { %v528_v5 = vsel %vm479_vm14, %v2248_v3, 0.0 }
 0x424   :  { %v520_v8 = vmul.f32 1.442695, %v508_v4  ;;  %529 = vadd.xlane.f32.xlu0 %v528_v5 }
 0x425   :  { %v488_v10 = vpop.xlane.xlu1 %487 }
 0x426   :  { %1735 = vpow2.f32 %v520_v8  ;;  %v506_v12 = vsub.f32 %v408_v28, %v488_v10 }
 0x428   :  { %v516_v16 = vmul.f32 1.442695, %v506_v12 }
 0x429   :  { %v497_v17 = vpop.xlane.xlu2 %496  ;;  %v500_v9 = vpop.xlane.xlu0 %499 }
 0x42a   :  { %1737 = vpow2.f32 %v516_v16  ;;  %v509_v27 = vsub.f32 %v444_v38, %v497_v17  ;;  %v510_v35 = vsub.f32 %v474_v31, %v500_v9 }
 0x42b   :  { %1739 = vpow2.f32 %v514_v14 }
 0x42c   :  { %v1736_v29 = vpop.eup %1735  ;;  %v522_v33 = vmul.f32 1.442695, %v509_v27  ;;  %v524_v41 = vmul.f32 1.442695, %v510_v35 }
 0x42d   :  { %v491_v15 = vpop.xlane.xlu1 %490  ;;  %v540_v40 = vsel %vm479_vm14, %v1736_v29, 0.0 }
 0x42e   :  { %541 = vadd.xlane.f32.xlu1 %v540_v40  ;;  %1741 = vpow2.f32 %v522_v33  ;;  %v507_v42 = vsub.f32 %v411_v44, %v491_v15 }
 0x42f   :  { %1743 = vpow2.f32 %v524_v41 }
 0x430   :  { %v1738_v13 = vpop.eup %1737  ;;  %v518_v38 = vmul.f32 1.442695, %v507_v42 }
 0x431   :  { %v503_v46 = vpop.xlane.xlu2 %502  ;;  %v534_v28 = vsel %vm479_vm14, %v1738_v13, 0.0  ;;  %v2254_v51 = vpop.eup %1739 }
 0x432   :  { %535 = vadd.xlane.f32.xlu2 %v534_v28  ;;  %v511_v54 = vsub.f32 %v477_v49, %v503_v46  ;;  %v531_v31 = vsel %vm479_vm14, %v2254_v51, 0.0  ;;  %1745 = vpow2.f32 %v518_v38 }
 0x434   :  { %v1742_v57 = vpop.eup %1741  ;;  %v526_v62 = vmul.f32 1.442695, %v511_v54 }
 0x435   :  { %v543_v44 = vsel %vm479_vm14, %v1742_v57, 0.0  ;;  %v1744_v0 = vpop.eup %1743 }
 0x436   :  { %532 = vadd.xlane.f32.xlu1 %v531_v31  ;;  %1747 = vpow2.f32 %v526_v62  ;;  %v546_v49 = vsel %vm479_vm14, %v1744_v0, 0.0 }
 0x438   :  { %1714 = vrot.lane.b32.xlu0 %v1713_v61, %s1894_s6  ;;  %v1746_v1 = vpop.eup %1745  ;;  %v2300_v61 = vld [vmem:[%s2629_s5] sm:$0xff] }
 0x439   :  { %v537_v4 = vsel %vm479_vm14, %v1746_v1, 0.0 }
 0x43a   :  { %544 = vadd.xlane.f32.xlu2 %v543_v44 }
 0x43c   :  { %v1748_v5 = vpop.eup %1747 }
 0x43d   :  { %v549_v23 = vsel %vm479_vm14, %v1748_v5, 0.0 }
 0x43e   :  { %547 = vadd.xlane.f32.xlu1 %v546_v49 }
 0x442   :  { %538 = vadd.xlane.f32.xlu2 %v537_v4 }
 0x446   :  { %550 = vadd.xlane.f32.xlu1 %v549_v23 }
 0x497   :  { %v530_v6 = vpop.xlane.xlu0 %529 }
 0x498   :  { %1749 = vrcp.f32 %v530_v6 }
 0x49e   :  { %v1750_v14 = vpop.eup %1749 }
 0x49f   :  { %v560_v15 = vmul.f32 %v1750_v14, %v2248_v3 }
 0x4a1   :  { %v542_v24 = vpop.xlane.xlu1 %541 }
 0x4a5   :  { %v536_v8 = vpop.xlane.xlu2 %535 }
 0x4a6   :  { %1751 = vrcp.f32 %v536_v8 }
 0x4a7   :  { %1753 = vrcp.f32 %v542_v24 }
 0x4a9   :  { %v533_v10 = vpop.xlane.xlu1 %532 }
 0x4aa   :  { %v1715_v12 = vpop.permute.xlu0 %1714  ;;  %1755 = vrcp.f32 %v533_v10 }
 0x4ab   :  { %v1716_v16 = vunpack.i.l.bf16 %v1715_v12  ;;  %v1717_v27 = vunpack.i.h.bf16 %v1715_v12 }
 0x4ac   :  { %v1752_v17 = vpop.eup %1751 }
 0x4ad   :  { %v1754_v9 = vpop.eup %1753  ;;  %v545_v33 = vpop.xlane.xlu2 %544  ;;  %594 = vmatpush.msra.mxu2 %v1716_v16  ;;  %623 = vmatpush.msrb.mxu1 %v1716_v16  ;;  %v562_v35 = vmul.f32 %v1752_v17, %v1738_v13 }
 0x4ae   :  { %1757 = vrcp.f32 %v545_v33  ;;  %652 = vmatpush.msra.mxu3 %v1716_v16  ;;  %681 = vmatpush.msrb.mxu0 %v1716_v16  ;;  %v564_v40 = vmul.f32 %v1754_v9, %v1736_v29 }
 0x4af   :  { %595 = vmatpush.msra.mxu2 %v1717_v27  ;;  %624 = vmatpush.msrb.mxu1 %v1717_v27 }
 0x4b0   :  { %653 = vmatpush.msra.mxu3 %v1717_v27  ;;  %682 = vmatpush.msrb.mxu0 %v1717_v27  ;;  %v1756_v13 = vpop.eup %1755 }
 0x4b1   :  { %1646 = vmatmul.msk.f32.vlgmr.msra.gmra.mxu2 %vm479_vm14, %v560_v15  ;;  %1648 = vmatmul.msk.f32.vlgmr.msrb.gmra.mxu1 %vm479_vm14, %v562_v35  ;;  %v548_v41 = vpop.xlane.xlu1 %547  ;;  %v561_v29 = vmul.f32 %v1756_v13, %v2254_v51  ;;  %v2288_v51 = vld [vmem:[%s2629_s5 + $0x10] sm:$0xff] }
 0x4b2   :  { %1650 = vmatmul.msk.f32.vlgmr.msra.gmra.mxu3 %vm479_vm14, %v564_v40  ;;  %1759 = vrcp.f32 %v548_v41  ;;  %939 = vmatpush.msra.mxu0 %v2053_v45 }
 0x4b4   :  { %v1758_v42 = vpop.eup %1757  ;;  %940 = vmatpush.msra.mxu0 %v2059_v47 }
 0x4b5   :  { %v539_v3 = vpop.xlane.xlu2 %538  ;;  %v565_v46 = vmul.f32 %v1758_v42, %v1742_v57  ;;  %v2294_v57 = vld [vmem:[%s2629_s5 + $0x8] sm:$0xff] }
 0x4b6   :  { %1761 = vrcp.f32 %v539_v3  ;;  %941 = vmatpush.msra.mxu0 %v2065_v48 }
 0x4b8   :  { %v1760_v28 = vpop.eup %1759  ;;  %942 = vmatpush.msra.mxu0 %v2071_v50  ;;  %v2282_v50 = vld [vmem:[%s2629_s5 + $0x18] sm:$0xff] }
 0x4b9   :  { %v566_v38 = vmul.f32 %v1760_v28, %v1744_v0  ;;  %1647 = vmatmul.msk.f32.gmra.mxu2 %vm479_vm14, %v561_v29  ;;  %v551_v54 = vpop.xlane.xlu1 %550  ;;  %v2362_v29 = vld [vmem:[%s2635_s11] sm:$0xff] }
 0x4ba   :  { %1651 = vmatmul.msk.f32.gmra.mxu3 %vm479_vm14, %v565_v46  ;;  %1763 = vrcp.f32 %v551_v54  ;;  %730 = vmatpush.msrb.mxu2 %v2282_v50  ;;  %v2350_v46 = vld [vmem:[%s2635_s11 + $0x10] sm:$0xff] }
 0x4bb   :  { %1652 = vmatmul.msk.f32.vlgmr.msrb.gmra.mxu0 %vm479_vm14, %v566_v38 }
 0x4bc   :  { %v1762_v45 = vpop.eup %1761  ;;  %731 = vmatpush.msrb.mxu2 %v2288_v51 }
 0x4bd   :  { %v563_v47 = vmul.f32 %v1762_v45, %v1746_v1 }
 0x4be   :  { %732 = vmatpush.msrb.mxu2 %v2294_v57 }
 0x4bf   :  { %1649 = vmatmul.msk.f32.gmra.mxu1 %vm479_vm14, %v563_v47 }
 0x4c0   :  { %v1764_v31 = vpop.eup %1763  ;;  %733 = vmatpush.msrb.mxu2 %v2300_v61 }
 0x4c1   :  { %v567_v48 = vmul.f32 %v1764_v31, %v1748_v5 }
 0x4c2   :  { %966 = vmatpush.msra.mxu2 %v2080_v55 }
 0x4c3   :  { %1653 = vmatmul.msk.f32.gmra.mxu0 %vm479_vm14, %v567_v48 }
 0x4c4   :  { %967 = vmatpush.msra.mxu2 %v2085_v56 }
 0x4c6   :  { %968 = vmatpush.msra.mxu2 %v2091_v58 }
 0x4c8   :  { %969 = vmatpush.msra.mxu2 %v2097_v59 }
 0x4ca   :  { %970 = vmatpush.msra.mxu2 %v2103_v60 }
 0x4cc   :  { %971 = vmatpush.msra.mxu2 %v2110_v63 }
 0x4ce   :  { %972 = vmatpush.msra.mxu2 %v2116_v2 }
 0x4d0   :  { %973 = vmatpush.msra.mxu2 %v2127_v18 }
 0x52e   :  { %v626_v62 = vpop.f32.mrf.mxu1 }
 0x52f   :  { %v692_v44 = vmul.f32 %v2143_v21, %v626_v62 }
 0x531   :  { %v699_v58 = vsel %vm204_vm5, %v692_v44, 0.0 }
 0x534   :  { %v597_v0 = vpop.f32.mrf.mxu2 }
 0x535   :  { %v690_v55 = vmul.f32 %v2133_v19, %v597_v0  ;;  %v655_v49 = vpop.f32.mrf.mxu3 }
 0x536   :  { %v694_v56 = vmul.f32 %v2138_v20, %v655_v49 }
 0x537   :  { %v698_v59 = vsel %vm204_vm5, %v690_v55, 0.0 }
 0x538   :  { %v700_v60 = vadd.f32 %v699_v58, %v698_v59  ;;  %v684_v1 = vpop.f32.mrf.mxu0  ;;  %v701_v63 = vsel %vm204_vm5, %v694_v56, 0.0 }
 0x539   :  { %v696_v2 = vmul.f32 %v2151_v22, %v684_v1 }
 0x53a   :  { %v702_v18 = vadd.f32 %v701_v63, %v700_v60 }
 0x53b   :  { %v703_v4 = vsel %vm204_vm5, %v696_v2, 0.0 }
 0x53c   :  { %v704_v5 = vadd.f32 %v703_v4, %v702_v18  ;;  %v600_v23 = vpop.f32.mrf.mxu2  ;;  %v629_v24 = vpop.f32.mrf.mxu1 }
 0x53d   :  { %v691_v6 = vmul.f32 %v2133_v19, %v600_v23  ;;  %v658_v8 = vpop.f32.mrf.mxu3  ;;  %v693_v10 = vmul.f32 %v2143_v21, %v629_v24 }
 0x53e   :  { %v695_v12 = vmul.f32 %v2138_v20, %v658_v8  ;;  %1654 = vmatmul.msk.f32.vlgmr.msrb.gmra.mxu2 %vm204_vm5, %v704_v5  ;;  %v2376_v8 = vld [vmem:[%s2636_s12 + $0x38] sm:$0xff] }
 0x53f   :  { %v705_v14 = vsel %vm204_vm5, %v691_v6, 0.0  ;;  %v706_v16 = vsel %vm204_vm5, %v693_v10, 0.0  ;;  %v2381_v10 = vld [vmem:[%s2636_s12 + $0x30] sm:$0xff]  ;;  %870 = vmatpush.msrb.mxu3 %v2376_v8 }
 0x540   :  { %v707_v17 = vadd.f32 %v706_v16, %v705_v14  ;;  %v687_v9 = vpop.f32.mrf.mxu0  ;;  %v708_v27 = vsel %vm204_vm5, %v695_v12, 0.0  ;;  %v2387_v12 = vld [vmem:[%s2636_s12 + $0x28] sm:$0xff]  ;;  %v2393_v14 = vld [vmem:[%s2636_s12 + $0x20] sm:$0xff] }
 0x541   :  { %v697_v33 = vmul.f32 %v2151_v22, %v687_v9  ;;  %871 = vmatpush.msrb.mxu3 %v2381_v10 }
 0x542   :  { %v709_v35 = vadd.f32 %v708_v27, %v707_v17  ;;  %v2399_v17 = vld [vmem:[%s2636_s12 + $0x18] sm:$0xff]  ;;  %v2405_v27 = vld [vmem:[%s2636_s12 + $0x10] sm:$0xff] }
 0x543   :  { %v710_v19 = vsel %vm204_vm5, %v697_v33, 0.0  ;;  %872 = vmatpush.msrb.mxu3 %v2387_v12  ;;  %v2411_v33 = vld [vmem:[%s2636_s12 + $0x8] sm:$0xff] }
 0x544   :  { %v711_v15 = vadd.f32 %v710_v19, %v709_v35 }
 0x545   :  { %873 = vmatpush.msrb.mxu3 %v2393_v14 }
 0x546   :  { %1655 = vmatmul.msk.f32.gmra.mxu2 %vm204_vm5, %v711_v15  ;;  %v2418_v15 = vld [vmem:[%s2636_s12] sm:$0xff] }
 0x547   :  { %874 = vmatpush.msrb.mxu3 %v2399_v17 }
 0x549   :  { %875 = vmatpush.msrb.mxu3 %v2405_v27 }
 0x54b   :  { %876 = vmatpush.msrb.mxu3 %v2411_v33 }
 0x54d   :  { %877 = vmatpush.msrb.mxu3 %v2418_v15 }
 0x5c1   :  { %v735_v21 = vpop.f32.mrf.mxu2 }
 0x5c2   :  { %v2330_v20 = vadd.f32 %v735_v21, %v2040_v34  ;;  %v2344_v34 = vld [vmem:[%s2635_s11 + $0x18] sm:$0xff] }
 0x5c3   :  { %795 = vmatpush.msra.mxu1 %v2344_v34 }
 0x5c4   :  { %v743_v40 = vmul.f32 %v2330_v20, %v2330_v20 }
 0x5c5   :  { %796 = vmatpush.msra.mxu1 %v2350_v46 }
 0x5c6   :  { %v745_v41 = vsel %vm204_vm5, %v743_v40, 0.0 }
 0x5c7   :  { %746 = vadd.xlane.f32.xlu0 %v745_v41 }
 0x5c9   :  { %v738_v13 = vpop.f32.mrf.mxu2 }
 0x5ca   :  { %v2336_v42 = vadd.f32 %v738_v13, %v2045_v39  ;;  %v2356_v39 = vld [vmem:[%s2635_s11 + $0x8] sm:$0xff] }
 0x5cb   :  { %797 = vmatpush.msra.mxu1 %v2356_v39 }
 0x5cc   :  { %v744_v22 = vmul.f32 %v2336_v42, %v2336_v42 }
 0x5cd   :  { %798 = vmatpush.msra.mxu1 %v2362_v29 }
 0x5ce   :  { %v748_v3 = vsel %vm204_vm5, %v744_v22, 0.0 }
 0x5cf   :  { %749 = vadd.xlane.f32.xlu2 %v748_v3 }
 0x63a   :  { %v747_v28 = vpop.xlane.xlu0 %746 }
 0x63b   :  { %v751_v38 = vmul.f32 %v747_v28, %v2074_v52 }
 0x63d   :  { %v753_v54 = vadd.f32 1e-06, %v751_v38 }
 0x63f   :  { %1765 = vrsqrt.f32 %v753_v54  ;;  %vm761_vm0 = vweird.f32 %v753_v54 }
 0x642   :  { %v750_v45 = vpop.xlane.xlu2 %749 }
 0x643   :  { %v752_v47 = vmul.f32 %v750_v45, %v2074_v52 }
 0x645   :  { %v1766_v31 = vpop.eup %1765  ;;  %v754_v48 = vadd.f32 1e-06, %v752_v47 }
 0x646   :  { %v756_v62 = vmul.f32 %v1766_v31, %v753_v54  ;;  %vm762_vm15 = vweird.f32 %v1766_v31 }
 0x647   :  { %1767 = vrsqrt.f32 %v754_v48  ;;  %vm763_vm1 = vmor %vm761_vm0, %vm762_vm15  ;;  %vm771_vm3 = vweird.f32 %v754_v48 }
 0x648   :  { %v757_v44 = vmul.f32 %v1766_v31, %v756_v62 }
 0x64a   :  { %v758_v0 = vmul.f32 0.5, %v757_v44 }
 0x64c   :  { %v759_v55 = vsub.f32 1.5, %v758_v0 }
 0x64d   :  { %v1768_v49 = vpop.eup %1767 }
 0x64e   :  { %v760_v56 = vmul.f32 %v1766_v31, %v759_v55  ;;  %v766_v58 = vmul.f32 %v1768_v49, %v754_v48  ;;  %vm772_vm2 = vweird.f32 %v1768_v49 }
 0x64f   :  { %vm773_vm4 = vmor %vm771_vm3, %vm772_vm2 }
 0x650   :  { %v764_v59 = vsel %vm763_vm1, %v1766_v31, %v760_v56  ;;  %v767_v60 = vmul.f32 %v1768_v49, %v766_v58 }
 0x651   :  { %v775_v1 = vmul.f32 %v764_v59, %v2330_v20 }
 0x652   :  { %v768_v63 = vmul.f32 0.5, %v767_v60 }
 0x653   :  { %1656 = vmatmul.msk.f32.vlgmr.msra.gmra.mxu1 %vm204_vm5, %v775_v1 }
 0x654   :  { %v769_v2 = vsub.f32 1.5, %v768_v63 }
 0x656   :  { %v770_v18 = vmul.f32 %v1768_v49, %v769_v2 }
 0x658   :  { %v774_v4 = vsel %vm773_vm4, %v1768_v49, %v770_v18 }
 0x659   :  { %v776_v5 = vmul.f32 %v774_v4, %v2336_v42 }
 0x65b   :  { %1657 = vmatmul.msk.f32.gmra.mxu1 %vm204_vm5, %v776_v5 }
 0x6d0   :  { %v800_v23 = vpop.f32.mrf.mxu1 }
 0x6d1   :  { %848 = vrot.lane.b32.xlu1 %v800_v23, %s1894_s6  ;;  %v1658_v6 = vmul.f32 -1.442695, %v800_v23 }
 0x6d3   :  { %1769 = vpow2.f32 %v1658_v6 }
 0x6d8   :  { %v803_v24 = vpop.f32.mrf.mxu1 }
 0x6d9   :  { %850 = vrot.lane.b32.xlu2 %v803_v24, %s1894_s6  ;;  %v1659_v16 = vmul.f32 -1.442695, %v803_v24  ;;  %v1770_v9 = vpop.eup %1769 }
 0x6da   :  { %v812_v35 = vadd.f32 1.0, %v1770_v9 }
 0x6db   :  { %1771 = vpow2.f32 %v1659_v16 }
 0x6dc   :  { %1773 = vrcp.f32 %v812_v35  ;;  %v825_v45 = vand.u32 2147483648, %v812_v35  ;;  %vm819_vm7 = vweird.f32 %v812_v35  ;;  %v823_v47 = vand.u32 2147483647, %v812_v35 }
 0x6de   :  { %v826_v62 = vor.u32 1.1754944e-38, %v825_v45  ;;  %vm824_vm9 = vcmp.eq.f32.partialorder %v823_v47, 8.507059e+37 }
 0x6e1   :  { %v1772_v19 = vpop.eup %1771 }
 0x6e2   :  { %v813_v21 = vadd.f32 1.0, %v1772_v19  ;;  %v1774_v40 = vpop.eup %1773 }
 0x6e3   :  { %v815_v41 = vmul.f32 %v1774_v40, %v812_v35  ;;  %vm820_vm6 = vweird.f32 %v1774_v40 }
 0x6e4   :  { %1775 = vrcp.f32 %v813_v21  ;;  %vm821_vm8 = vmor %vm819_vm7, %vm820_vm6  ;;  %v840_v55 = vand.u32 2147483648, %v813_v21  ;;  %vm834_vm11 = vweird.f32 %v813_v21  ;;  %v838_v49 = vand.u32 2147483647, %v813_v21 }
 0x6e5   :  { %v816_v13 = vsub.f32 1.0, %v815_v41 }
 0x6e6   :  { %v841_v1 = vor.u32 1.1754944e-38, %v840_v55  ;;  %vm839_vm15 = vcmp.eq.f32.partialorder %v838_v49, 8.507059e+37 }
 0x6e7   :  { %v817_v28 = vmul.f32 %v1774_v40, %v816_v13 }
 0x6e9   :  { %v818_v54 = vadd.f32 %v1774_v40, %v817_v28 }
 0x6ea   :  { %v1776_v22 = vpop.eup %1775 }
 0x6eb   :  { %v830_v3 = vmul.f32 %v1776_v22, %v813_v21  ;;  %v822_v48 = vsel %vm821_vm8, %v1774_v40, %v818_v54  ;;  %vm835_vm10 = vweird.f32 %v1776_v22 }
 0x6ec   :  { %v827_v44 = vsel %vm824_vm9, %v826_v62, %v822_v48  ;;  %vm836_vm12 = vmor %vm834_vm11, %vm835_vm10 }
 0x6ed   :  { %v831_v38 = vsub.f32 1.0, %v830_v3  ;;  %v844_v56 = vmul.f32 %v827_v44, %v800_v23 }
 0x6ef   :  { %v832_v31 = vmul.f32 %v1776_v22, %v831_v38 }
 0x6f1   :  { %v833_v0 = vadd.f32 %v1776_v22, %v832_v31 }
 0x6f3   :  { %v837_v59 = vsel %vm836_vm12, %v1776_v22, %v833_v0 }
 0x6f4   :  { %v842_v63 = vsel %vm839_vm15, %v841_v1, %v837_v59 }
 0x6f5   :  { %v845_v18 = vmul.f32 %v842_v63, %v803_v24 }
 0x733   :  { %v851_v2 = vpop.permute.xlu2 %850 }
 0x734   :  { %v855_v4 = vmul.f32 %v851_v2, %v845_v18 }
 0x743   :  { %v849_v58 = vpop.permute.xlu1 %848 }
 0x744   :  { %v854_v60 = vmul.f32 %v849_v58, %v844_v56 }
 0x746   :  { %1660 = vmatmul.msk.f32.vlgmr.msrb.gmra.mxu3 %vm275_vm13, %v854_v60 }
 0x74e   :  { %1661 = vmatmul.msk.f32.gmra.mxu3 %vm275_vm13, %v855_v4 }
 0x7c9   :  { %v879_v5 = vpop.f32.mrf.mxu3 }
 0x7ca   :  { %v2424_v6 = vadd.f32 %v879_v5, %v2330_v20 }
 0x7cc   :  { %v887_v23 = vmul.f32 %v2424_v6, %v2424_v6 }
 0x7ce   :  { %v889_v16 = vsel %vm204_vm5, %v887_v23, 0.0 }
 0x7cf   :  { %890 = vadd.xlane.f32.xlu1 %v889_v16 }
 0x7d1   :  { %v882_v9 = vpop.f32.mrf.mxu3 }
 0x7d2   :  { %v2430_v35 = vadd.f32 %v882_v9, %v2336_v42 }
 0x7d4   :  { %v888_v24 = vmul.f32 %v2430_v35, %v2430_v35 }
 0x7d6   :  { %v892_v19 = vsel %vm204_vm5, %v888_v24, 0.0 }
 0x7d7   :  { %893 = vadd.xlane.f32.xlu2 %v892_v19 }
 0x842   :  { %v891_v21 = vpop.xlane.xlu1 %890 }
 0x843   :  { %v895_v20 = vmul.f32 %v891_v21, %v2074_v52 }
 0x845   :  { %v897_v40 = vadd.f32 1e-06, %v895_v20 }
 0x847   :  { %1777 = vrsqrt.f32 %v897_v40  ;;  %vm905_vm1 = vweird.f32 %v897_v40 }
 0x84a   :  { %v894_v41 = vpop.xlane.xlu2 %893 }
 0x84b   :  { %v896_v13 = vmul.f32 %v894_v41, %v2074_v52 }
 0x84d   :  { %v1778_v22 = vpop.eup %1777  ;;  %v898_v3 = vadd.f32 1e-06, %v896_v13 }
 0x84e   :  { %v900_v28 = vmul.f32 %v1778_v22, %v897_v40  ;;  %vm906_vm0 = vweird.f32 %v1778_v22 }
 0x84f   :  { %1779 = vrsqrt.f32 %v898_v3  ;;  %vm907_vm2 = vmor %vm905_vm1, %vm906_vm0  ;;  %vm915_vm4 = vweird.f32 %v898_v3 }
 0x850   :  { %v901_v42 = vmul.f32 %v1778_v22, %v900_v28 }
 0x852   :  { %v902_v38 = vmul.f32 0.5, %v901_v42 }
 0x854   :  { %v903_v54 = vsub.f32 1.5, %v902_v38 }
 0x855   :  { %v1780_v45 = vpop.eup %1779 }
 0x856   :  { %v904_v47 = vmul.f32 %v1778_v22, %v903_v54  ;;  %v910_v31 = vmul.f32 %v1780_v45, %v898_v3  ;;  %vm916_vm3 = vweird.f32 %v1780_v45 }
 0x857   :  { %vm917_vm6 = vmor %vm915_vm4, %vm916_vm3 }
 0x858   :  { %v908_v48 = vsel %vm907_vm2, %v1778_v22, %v904_v47  ;;  %v911_v62 = vmul.f32 %v1780_v45, %v910_v31 }
 0x859   :  { %v919_v44 = vmul.f32 %v908_v48, %v2424_v6 }
 0x85a   :  { %v912_v0 = vmul.f32 0.5, %v911_v62 }
 0x85b   :  { %1662 = vmatmul.msk.f32.vlgmr.msra.gmra.mxu0 %vm204_vm5, %v919_v44 }
 0x85c   :  { %v913_v55 = vsub.f32 1.5, %v912_v0 }
 0x85e   :  { %v914_v49 = vmul.f32 %v1780_v45, %v913_v55 }
 0x860   :  { %v918_v56 = vsel %vm917_vm6, %v1780_v45, %v914_v49 }
 0x861   :  { %v920_v58 = vmul.f32 %v918_v56, %v2430_v35 }
 0x863   :  { %1663 = vmatmul.msk.f32.gmra.mxu0 %vm204_vm5, %v920_v58 }
 0x8d8   :  { %v2441_v59 = vpop.f32.mrf.mxu0 }
 0x8d9   :  { %1664 = vmatmul.msk.f32.vlgmr.msra.gmra.mxu2 %vm275_vm13, %v2441_v59  ;;  %v950_v63 = vmul.f32 %v2441_v59, %v2165_v25 }
 0x8e0   :  { %v2445_v60 = vpop.f32.mrf.mxu0 }
 0x8e1   :  { %1665 = vmatmul.msk.f32.gmra.mxu2 %vm275_vm13, %v2445_v60  ;;  %v951_v16 = vmul.f32 %v2445_v60, %v2184_v36 }
 0x95c   :  { %v975_v1 = vpop.f32.mrf.mxu2 }
 0x95d   :  { %v981_v2 = vmul.f32 %v975_v1, %v2170_v26 }
 0x95f   :  { %v983_v18 = vadd.f32 %v981_v2, %v950_v63 }
 0x961   :  { %v991_v4 = vmul.f32 %v983_v18, %v2206_v53  ;;  %v987_v5 = vmul.f32 %v983_v18, %v2175_v30  ;;  %v985_v21 = vmul.f32 %v983_v18, %v2177_v32 }
 0x963   :  { %1100 = vrot.lane.b32.xlu1 %v991_v4, %s1893_s2  ;;  %1034 = vrot.lane.b32.xlu0 %v987_v5, %s1893_s2 }
 0x964   :  { %v978_v23 = vpop.f32.mrf.mxu2 }
 0x965   :  { %v982_v9 = vmul.f32 %v978_v23, %v2189_v37 }
 0x967   :  { %v984_v24 = vadd.f32 %v982_v9, %v951_v16 }
 0x969   :  { %v988_v25 = vmul.f32 %v984_v24, %v2175_v30  ;;  %v986_v26 = vmul.f32 %v984_v24, %v2177_v32  ;;  %v992_v19 = vmul.f32 %v984_v24, %v2206_v53  ;;  %v990_v36 = vmul.f32 %v984_v24, %v2196_v43 }
 0x96a   :  { %v989_v30 = vmul.f32 %v983_v18, %v2196_v43 }
 0x96b   :  { %1036 = vrot.lane.b32.xlu0 %v988_v25, %s1893_s2  ;;  %997 = vrot.lane.b32.xlu2 %v986_v26, %s1893_s2 }
 0x973   :  { %1102 = vrot.lane.b32.xlu0 %v992_v19, %s1893_s2 }
 0x97b   :  { %995 = vrot.lane.b32.xlu0 %v985_v21, %s1893_s2 }
 0x983   :  { %1069 = vrot.lane.b32.xlu0 %v990_v36, %s1893_s2 }
 0x98b   :  { %1067 = vrot.lane.b32.xlu0 %v989_v30, %s1893_s2 }
 0x9c5   :  { %v998_v37 = vpop.permute.xlu2 %997 }
 0x9c6   :  { %1666 = vmatpush.xpose.msk.msrb.mxu1 %vm204_vm5, %v998_v37 }
 0x9d5   :  { %v1035_v20 = vpop.permute.xlu0 %1034  ;;  %v1101_v53 = vpop.permute.xlu1 %1100 }
 0x9dd   :  { %v1037_v40 = vpop.permute.xlu0 %1036 }
 0x9de   :  { %1670 = vmatpush.xpose.msk.msra.mxu3 %vm204_vm5, %v1037_v40 }
 0x9e2   :  { %1671 = vmatpush.xpose.msk.msra.mxu3 %vm204_vm5, %v1035_v20 }
 0x9e5   :  { %1672 = vmatmul.msk.f32.vlgmr.msra.gmra.mxu3 %vm204_vm5, %v983_v18  ;;  %v1103_v32 = vpop.permute.xlu0 %1102 }
 0x9e6   :  { %1678 = vmatpush.xpose.msk.msrb.mxu2 %vm204_vm5, %v1103_v32 }
 0x9ea   :  { %1679 = vmatpush.xpose.msk.msrb.mxu2 %vm204_vm5, %v1101_v53 }
 0x9ed   :  { %1673 = vmatmul.msk.f32.gmra.mxu3 %vm204_vm5, %v984_v24  ;;  %1680 = vmatmul.msk.f32.vlgmr.msrb.gmra.mxu2 %vm204_vm5, %v983_v18  ;;  %v996_v43 = vpop.permute.xlu0 %995 }
 0x9ee   :  { %1667 = vmatpush.xpose.msk.msrb.mxu1 %vm204_vm5, %v996_v43 }
 0x9f1   :  { %1668 = vmatmul.msk.f32.vlgmr.msrb.gmra.mxu1 %vm204_vm5, %v983_v18 }
 0x9f5   :  { %1681 = vmatmul.msk.f32.gmra.mxu2 %vm204_vm5, %v984_v24  ;;  %v1070_v41 = vpop.permute.xlu0 %1069 }
 0x9f6   :  { %1674 = vmatpush.xpose.msk.msrb.mxu0 %vm204_vm5, %v1070_v41 }
 0x9f9   :  { %1669 = vmatmul.msk.f32.gmra.mxu1 %vm204_vm5, %v984_v24 }
 0x9fd   :  { %v1068_v13 = vpop.permute.xlu0 %1067 }
 0x9fe   :  { %1675 = vmatpush.xpose.msk.msrb.mxu0 %vm204_vm5, %v1068_v13 }
 0xa01   :  { %1676 = vmatmul.msk.f32.vlgmr.msrb.gmra.mxu0 %vm204_vm5, %v983_v18 }
 0xa09   :  { %1677 = vmatmul.msk.f32.gmra.mxu0 %vm204_vm5, %v984_v24 }
 0xa68   :  { %v1059_v22 = vpop.f32.mrf.mxu3 }
 0xa69   :  { %v1060_v3 = vadd.f32 %v1059_v22, %v2228_v7 }
 0xa6b   :  { %v1137_v28 = vsel %vm479_vm14, %v1060_v3, -inf }
 0xa6c   :  { %1138 = vmax.xlane.f32.xlu1 %v1137_v28 }
 0xa6e   :  { %v1026_v42 = vpop.f32.mrf.mxu1 }
 0xa6f   :  { %v1027_v38 = vadd.f32 %v1026_v42, %v2228_v7 }
 0xa70   :  { %v1062_v54 = vpop.f32.mrf.mxu3  ;;  %v1125_v45 = vpop.f32.mrf.mxu2 }
 0xa71   :  { %v1063_v47 = vadd.f32 %v1062_v54, %v2232_v11  ;;  %v1126_v31 = vadd.f32 %v1125_v45, %v2228_v7  ;;  %v1131_v48 = vsel %vm479_vm14, %v1027_v38, -inf }
 0xa72   :  { %1132 = vmax.xlane.f32.xlu0 %v1131_v48 }
 0xa73   :  { %v1140_v62 = vsel %vm479_vm14, %v1063_v47, -inf  ;;  %v1149_v44 = vsel %vm479_vm14, %v1126_v31, -inf }
 0xa74   :  { %1141 = vmax.xlane.f32.xlu1 %v1140_v62  ;;  %1150 = vmax.xlane.f32.xlu2 %v1149_v44  ;;  %v1718_v44 = vpack.i.bf16 %v2441_v59, %v2445_v60 }
 0xa76   :  { %v1029_v0 = vpop.f32.mrf.mxu1 }
 0xa77   :  { %v1030_v55 = vadd.f32 %v1029_v0, %v2232_v11 }
 0xa78   :  { %v1128_v49 = vpop.f32.mrf.mxu2 }
 0xa79   :  { %v1129_v56 = vadd.f32 %v1128_v49, %v2232_v11  ;;  %v1134_v58 = vsel %vm479_vm14, %v1030_v55, -inf }
 0xa7b   :  { %v1152_v1 = vsel %vm479_vm14, %v1129_v56, -inf }
 0xa7c   :  { %1135 = vmax.xlane.f32.xlu1 %v1134_v58  ;;  %1153 = vmax.xlane.f32.xlu0 %v1152_v1 }
 0xa7e   :  { %v1092_v63 = vpop.f32.mrf.mxu0 }
 0xa7f   :  { %v1093_v2 = vadd.f32 %v1092_v63, %v2228_v7 }
 0xa81   :  { %v1143_v18 = vsel %vm479_vm14, %v1093_v2, -inf }
 0xa82   :  { %1144 = vmax.xlane.f32.xlu2 %v1143_v18 }
 0xa86   :  { %v1095_v4 = vpop.f32.mrf.mxu0 }
 0xa87   :  { %v1096_v5 = vadd.f32 %v1095_v4, %v2232_v11 }
 0xa89   :  { %v1146_v23 = vsel %vm479_vm14, %v1096_v5, -inf }
 0xa8a   :  { %1147 = vmax.xlane.f32.xlu2 %v1146_v23 }
 0xadf   :  { %v1139_v16 = vpop.xlane.xlu1 %1138 }
 0xae0   :  { %v1157_v9 = vsub.f32 %v1060_v3, %v1139_v16 }
 0xae2   :  { %v1167_v24 = vmul.f32 1.442695, %v1157_v9 }
 0xae4   :  { %1781 = vpow2.f32 %v1167_v24 }
 0xae5   :  { %v1133_v25 = vpop.xlane.xlu0 %1132 }
 0xae6   :  { %v1155_v26 = vsub.f32 %v1027_v38, %v1133_v25 }
 0xae7   :  { %v1151_v19 = vpop.xlane.xlu2 %1150  ;;  %v1142_v36 = vpop.xlane.xlu1 %1141 }
 0xae8   :  { %v1163_v21 = vmul.f32 1.442695, %v1155_v26  ;;  %v1161_v30 = vsub.f32 %v1126_v31, %v1151_v19  ;;  %v1158_v20 = vsub.f32 %v1063_v47, %v1142_v36 }
 0xaea   :  { %v2503_v7 = vpop.eup %1781  ;;  %1783 = vpow2.f32 %v1163_v21  ;;  %v1175_v37 = vmul.f32 1.442695, %v1161_v30  ;;  %v1169_v40 = vmul.f32 1.442695, %v1158_v20 }
 0xaeb   :  { %v1185_v11 = vsel %vm479_vm14, %v2503_v7, 0.0 }
 0xaec   :  { %1186 = vadd.xlane.f32.xlu0 %v1185_v11  ;;  %1785 = vpow2.f32 %v1175_v37 }
 0xaed   :  { %1787 = vpow2.f32 %v1169_v40 }
 0xaef   :  { %v1154_v53 = vpop.xlane.xlu0 %1153  ;;  %v1136_v3 = vpop.xlane.xlu1 %1135 }
 0xaf0   :  { %v1784_v32 = vpop.eup %1783  ;;  %v1162_v13 = vsub.f32 %v1129_v56, %v1154_v53  ;;  %v1156_v54 = vsub.f32 %v1030_v55, %v1136_v3 }
 0xaf1   :  { %v1179_v43 = vsel %vm479_vm14, %v1784_v32, 0.0 }
 0xaf2   :  { %1180 = vadd.xlane.f32.xlu2 %v1179_v43  ;;  %v1786_v41 = vpop.eup %1785  ;;  %v1177_v38 = vmul.f32 1.442695, %v1162_v13  ;;  %v1165_v31 = vmul.f32 1.442695, %v1156_v54 }
 0xaf3   :  { %v1197_v22 = vsel %vm479_vm14, %v1786_v41, 0.0  ;;  %v2509_v47 = vpop.eup %1787 }
 0xaf4   :  { %1198 = vadd.xlane.f32.xlu1 %v1197_v22  ;;  %v1188_v48 = vsel %vm479_vm14, %v2509_v47, 0.0  ;;  %v1832_v22 = vld [vmem:[%s2633_s9 + $0x3] ss:$0 sm:$0xff] }
 0xaf5   :  { %v1145_v28 = vpop.xlane.xlu2 %1144 }
 0xaf6   :  { %v1159_v42 = vsub.f32 %v1093_v2, %v1145_v28 }
 0xaf8   :  { %v1171_v45 = vmul.f32 1.442695, %v1159_v42 }
 0xafa   :  { %1789 = vpow2.f32 %v1171_v45 }
 0xafb   :  { %1791 = vpow2.f32 %v1177_v38 }
 0xafc   :  { %1189 = vadd.xlane.f32.xlu1 %v1188_v48  ;;  %1793 = vpow2.f32 %v1165_v31 }
 0xafd   :  { %v1148_v62 = vpop.xlane.xlu2 %1147 }
 0xafe   :  { %v1160_v0 = vsub.f32 %v1096_v5, %v1148_v62 }
 0xb00   :  { %v1790_v49 = vpop.eup %1789  ;;  %v1173_v56 = vmul.f32 1.442695, %v1160_v0  ;;  %1719 = vrot.lane.b32.xlu0 %v1718_v44, %s1894_s6 }
 0xb01   :  { %v1792_v55 = vpop.eup %1791  ;;  %v1191_v58 = vsel %vm479_vm14, %v1790_v49, 0.0 }
 0xb02   :  { %1192 = vadd.xlane.f32.xlu2 %v1191_v58  ;;  %1795 = vpow2.f32 %v1173_v56  ;;  %v1200_v1 = vsel %vm479_vm14, %v1792_v55, 0.0  ;;  %v2518_v63 = vpop.eup %1793 }
 0xb03   :  { %v1182_v59 = vsel %vm479_vm14, %v2518_v63, 0.0 }
 0xb04   :  { %1201 = vadd.xlane.f32.xlu1 %v1200_v1 }
 0xb08   :  { %v2520_v2 = vpop.eup %1795 }
 0xb09   :  { %v1194_v60 = vsel %vm479_vm14, %v2520_v2, 0.0 }
 0xb0a   :  { %1183 = vadd.xlane.f32.xlu2 %v1182_v59 }
 0xb0c   :  { %1195 = vadd.xlane.f32.xlu1 %v1194_v60 }
 0xb5f   :  { %v1187_v4 = vpop.xlane.xlu0 %1186 }
 0xb60   :  { %1797 = vrcp.f32 %v1187_v4 }
 0xb65   :  { %v1181_v5 = vpop.xlane.xlu2 %1180 }
 0xb66   :  { %1799 = vrcp.f32 %v1181_v5  ;;  %v1798_v9 = vpop.eup %1797 }
 0xb67   :  { %v1199_v18 = vpop.xlane.xlu1 %1198  ;;  %v1213_v36 = vmul.f32 %v1798_v9, %v2503_v7 }
 0xb68   :  { %1801 = vrcp.f32 %v1199_v18 }
 0xb6c   :  { %v1800_v25 = vpop.eup %1799 }
 0xb6d   :  { %v1211_v30 = vmul.f32 %v1800_v25, %v1784_v32 }
 0xb6e   :  { %v1802_v26 = vpop.eup %1801 }
 0xb6f   :  { %v1190_v23 = vpop.xlane.xlu1 %1189  ;;  %v1217_v37 = vmul.f32 %v1802_v26, %v1786_v41 }
 0xb70   :  { %1803 = vrcp.f32 %v1190_v23 }
 0xb72   :  { %v1720_v16 = vpop.permute.xlu0 %1719 }
 0xb73   :  { %v1721_v24 = vunpack.i.l.bf16 %v1720_v16  ;;  %v1722_v19 = vunpack.i.h.bf16 %v1720_v16 }
 0xb75   :  { %1245 = vmatpush.msra.mxu1 %v1721_v24  ;;  %1274 = vmatpush.msrb.mxu3 %v1721_v24  ;;  %v1193_v21 = vpop.xlane.xlu2 %1192 }
 0xb76   :  { %1303 = vmatpush.msra.mxu0 %v1721_v24  ;;  %1332 = vmatpush.msra.mxu2 %v1721_v24  ;;  %1805 = vrcp.f32 %v1193_v21  ;;  %v1804_v11 = vpop.eup %1803 }
 0xb77   :  { %1246 = vmatpush.msra.mxu1 %v1722_v19  ;;  %1275 = vmatpush.msrb.mxu3 %v1722_v19  ;;  %v1202_v20 = vpop.xlane.xlu1 %1201 }
 0xb78   :  { %1304 = vmatpush.msra.mxu0 %v1722_v19  ;;  %1333 = vmatpush.msra.mxu2 %v1722_v19  ;;  %1807 = vrcp.f32 %v1202_v20 }
 0xb79   :  { %1682 = vmatmul.msk.f32.vlgmr.msra.gmra.mxu1 %vm479_vm14, %v1211_v30  ;;  %1684 = vmatmul.msk.f32.vlgmr.msrb.gmra.mxu3 %vm479_vm14, %v1213_v36 }
 0xb7a   :  { %1688 = vmatmul.msk.f32.vlgmr.msra.gmra.mxu2 %vm479_vm14, %v1217_v37  ;;  %1381 = vmatpush.msrb.mxu1 %v2282_v50  ;;  %v1214_v50 = vmul.f32 %v1804_v11, %v2509_v47 }
 0xb7b   :  { %1446 = vmatpush.msra.mxu3 %v2344_v34  ;;  %1521 = vmatpush.msrb.mxu0 %v2376_v8 }
 0xb7c   :  { %v1806_v7 = vpop.eup %1805  ;;  %1382 = vmatpush.msrb.mxu1 %v2288_v51 }
 0xb7d   :  { %v1215_v40 = vmul.f32 %v1806_v7, %v1790_v49  ;;  %v1184_v32 = vpop.xlane.xlu2 %1183  ;;  %1447 = vmatpush.msra.mxu3 %v2350_v46  ;;  %1522 = vmatpush.msrb.mxu0 %v2381_v10 }
 0xb7e   :  { %1809 = vrcp.f32 %v1184_v32  ;;  %1383 = vmatpush.msrb.mxu1 %v2294_v57  ;;  %v1808_v53 = vpop.eup %1807 }
 0xb7f   :  { %1686 = vmatmul.msk.f32.vlgmr.msra.gmra.mxu0 %vm479_vm14, %v1215_v40  ;;  %1448 = vmatpush.msra.mxu3 %v2356_v39  ;;  %v1196_v34 = vpop.xlane.xlu1 %1195  ;;  %v1218_v8 = vmul.f32 %v1808_v53, %v1792_v55 }
 0xb80   :  { %1384 = vmatpush.msrb.mxu1 %v2300_v61  ;;  %1523 = vmatpush.msrb.mxu0 %v2387_v12  ;;  %1811 = vrcp.f32 %v1196_v34 }
 0xb81   :  { %1685 = vmatmul.msk.f32.gmra.mxu3 %vm479_vm14, %v1214_v50 }
 0xb82   :  { %1689 = vmatmul.msk.f32.gmra.mxu2 %vm479_vm14, %v1218_v8  ;;  %1449 = vmatpush.msra.mxu3 %v2362_v29  ;;  %v1829_v29 = vld [vmem:[%s2633_s9] ss:$0 sm:$0xff] }
 0xb83   :  { %1524 = vmatpush.msrb.mxu0 %v2393_v14 }
 0xb84   :  { %v1810_v51 = vpop.eup %1809 }
 0xb85   :  { %v1212_v57 = vmul.f32 %v1810_v51, %v2518_v63  ;;  %1525 = vmatpush.msrb.mxu0 %v2399_v17  ;;  %v1830_v17 = vld [vmem:[%s2633_s9 + $0x1] ss:$0 sm:$0xff] }
 0xb86   :  { %v1812_v46 = vpop.eup %1811 }
 0xb87   :  { %1683 = vmatmul.msk.f32.gmra.mxu1 %vm479_vm14, %v1212_v57  ;;  %1526 = vmatpush.msrb.mxu0 %v2405_v27  ;;  %v1216_v61 = vmul.f32 %v1812_v46, %v2520_v2 }
 0xb89   :  { %1527 = vmatpush.msrb.mxu0 %v2411_v33  ;;  %v1831_v33 = vld [vmem:[%s2633_s9 + $0x2] ss:$0 sm:$0xff] }
 0xb8a   :  { %1687 = vmatmul.msk.f32.gmra.mxu0 %vm479_vm14, %v1216_v61 }
 0xb8b   :  { %1528 = vmatpush.msrb.mxu0 %v2418_v15 }
 0xbf6   :  { %v1248_v39 = vpop.f32.mrf.mxu1 }
 0xbf7   :  { %v1341_v10 = vmul.f32 %v1829_v29, %v1248_v39 }
 0xbf9   :  { %v1349_v15 = vsel %vm204_vm5, %v1341_v10, 0.0 }
 0xbfc   :  { %v1277_v12 = vpop.f32.mrf.mxu3  ;;  %v1306_v14 = vpop.f32.mrf.mxu0 }
 0xbfd   :  { %v1343_v27 = vmul.f32 %v1830_v17, %v1277_v12  ;;  %v1335_v43 = vpop.f32.mrf.mxu2  ;;  %v1345_v41 = vmul.f32 %v1831_v33, %v1306_v14 }
 0xbfe   :  { %v1347_v3 = vmul.f32 %v1832_v22, %v1335_v43 }
 0xbff   :  { %v1350_v13 = vsel %vm204_vm5, %v1343_v27, 0.0  ;;  %v1352_v28 = vsel %vm204_vm5, %v1345_v41, 0.0 }
 0xc00   :  { %v1351_v42 = vadd.f32 %v1350_v13, %v1349_v15  ;;  %v1354_v54 = vsel %vm204_vm5, %v1347_v3, 0.0 }
 0xc02   :  { %v1353_v38 = vadd.f32 %v1352_v28, %v1351_v42 }
 0xc04   :  { %v1355_v45 = vadd.f32 %v1354_v54, %v1353_v38  ;;  %v1280_v47 = vpop.f32.mrf.mxu3  ;;  %v1251_v31 = vpop.f32.mrf.mxu1 }
 0xc05   :  { %v1344_v48 = vmul.f32 %v1830_v17, %v1280_v47  ;;  %v1342_v62 = vmul.f32 %v1829_v29, %v1251_v31  ;;  %v1338_v44 = vpop.f32.mrf.mxu2 }
 0xc06   :  { %1690 = vmatmul.msk.f32.vlgmr.msrb.gmra.mxu1 %vm204_vm5, %v1355_v45  ;;  %v1348_v58 = vmul.f32 %v1832_v22, %v1338_v44 }
 0xc07   :  { %v1357_v0 = vsel %vm204_vm5, %v1344_v48, 0.0  ;;  %v1356_v49 = vsel %vm204_vm5, %v1342_v62, 0.0  ;;  %v1309_v56 = vpop.f32.mrf.mxu0 }
 0xc08   :  { %v1358_v55 = vadd.f32 %v1357_v0, %v1356_v49  ;;  %v1346_v1 = vmul.f32 %v1831_v33, %v1309_v56  ;;  %v1361_v59 = vsel %vm204_vm5, %v1348_v58, 0.0 }
 0xc0a   :  { %v1359_v63 = vsel %vm204_vm5, %v1346_v1, 0.0 }
 0xc0b   :  { %v1360_v2 = vadd.f32 %v1359_v63, %v1358_v55 }
 0xc0d   :  { %v1362_v60 = vadd.f32 %v1361_v59, %v1360_v2 }
 0xc0f   :  { %1691 = vmatmul.msk.f32.gmra.mxu1 %vm204_vm5, %v1362_v60 }
 0xc83   :  { %v1386_v18 = vpop.f32.mrf.mxu1 }
 0xc84   :  { %v2577_v4 = vadd.f32 %v1386_v18, %v2424_v6 }
 0xc86   :  { %v1394_v5 = vmul.f32 %v2577_v4, %v2577_v4 }
 0xc88   :  { %v1396_v23 = vsel %vm204_vm5, %v1394_v5, 0.0 }
 0xc89   :  { %1397 = vadd.xlane.f32.xlu0 %v1396_v23 }
 0xc8c   :  { %v1389_v16 = vpop.f32.mrf.mxu1 }
 0xc8d   :  { %v2583_v9 = vadd.f32 %v1389_v16, %v2430_v35 }
 0xc8f   :  { %v1395_v24 = vmul.f32 %v2583_v9, %v2583_v9 }
 0xc91   :  { %v1399_v25 = vsel %vm204_vm5, %v1395_v24, 0.0 }
 0xc92   :  { %1400 = vadd.xlane.f32.xlu2 %v1399_v25 }
 0xcfc   :  { %v1398_v26 = vpop.xlane.xlu0 %1397 }
 0xcfd   :  { %v1402_v6 = vmul.f32 %v1398_v26, %v2074_v52 }
 0xcff   :  { %v1404_v19 = vadd.f32 1e-06, %v1402_v6 }
 0xd01   :  { %1813 = vrsqrt.f32 %v1404_v19  ;;  %vm1412_vm7 = vweird.f32 %v1404_v19 }
 0xd05   :  { %v1401_v21 = vpop.xlane.xlu2 %1400 }
 0xd06   :  { %v1403_v36 = vmul.f32 %v1401_v21, %v2074_v52  ;;  %v201_v21 = vld [vmem:[%s2637_s13 + $0x18] sm:$0xff] }
 0xd07   :  { %v1814_v30 = vpop.eup %1813  ;;  %1590 = vmatpush.msrb.mxu2 %v201_v21 }
 0xd08   :  { %v1407_v37 = vmul.f32 %v1814_v30, %v1404_v19  ;;  %v1405_v20 = vadd.f32 1e-06, %v1403_v36  ;;  %vm1413_vm14 = vweird.f32 %v1814_v30  ;;  %v199_v36 = vld [vmem:[%s2637_s13 + $0x8] sm:$0xff] }
 0xd09   :  { %vm1414_vm8 = vmor %vm1412_vm7, %vm1413_vm14 }
 0xd0a   :  { %v1408_v11 = vmul.f32 %v1814_v30, %v1407_v37  ;;  %1815 = vrsqrt.f32 %v1405_v20  ;;  %vm1422_vm10 = vweird.f32 %v1405_v20 }
 0xd0c   :  { %v1409_v35 = vmul.f32 0.5, %v1408_v11 }
 0xd0e   :  { %v1410_v7 = vsub.f32 1.5, %v1409_v35 }
 0xd10   :  { %v1816_v40 = vpop.eup %1815  ;;  %v1411_v32 = vmul.f32 %v1814_v30, %v1410_v7 }
 0xd11   :  { %v1417_v53 = vmul.f32 %v1816_v40, %v1405_v20  ;;  %vm1423_vm9 = vweird.f32 %v1816_v40 }
 0xd12   :  { %v1415_v50 = vsel %vm1414_vm8, %v1814_v30, %v1411_v32  ;;  %vm1424_vm11 = vmor %vm1422_vm10, %vm1423_vm9 }
 0xd13   :  { %v1426_v34 = vmul.f32 %v1415_v50, %v2577_v4  ;;  %v1418_v8 = vmul.f32 %v1816_v40, %v1417_v53 }
 0xd15   :  { %v1419_v51 = vmul.f32 0.5, %v1418_v8  ;;  %1692 = vmatmul.msk.f32.vlgmr.msra.gmra.mxu3 %vm204_vm5, %v1426_v34 }
 0xd17   :  { %v1420_v57 = vsub.f32 1.5, %v1419_v51 }
 0xd19   :  { %v1421_v46 = vmul.f32 %v1816_v40, %v1420_v57 }
 0xd1b   :  { %v1425_v61 = vsel %vm1424_vm11, %v1816_v40, %v1421_v46 }
 0xd1c   :  { %v1427_v39 = vmul.f32 %v1425_v61, %v2583_v9 }
 0xd1e   :  { %1693 = vmatmul.msk.f32.gmra.mxu3 %vm204_vm5, %v1427_v39 }
 0xd98   :  { %v1451_v29 = vpop.f32.mrf.mxu3 }
 0xd99   :  { %1499 = vrot.lane.b32.xlu1 %v1451_v29, %s1894_s6  ;;  %v1694_v12 = vmul.f32 -1.442695, %v1451_v29 }
 0xd9b   :  { %1817 = vpow2.f32 %v1694_v12 }
 0xda1   :  { %v1454_v10 = vpop.f32.mrf.mxu3  ;;  %v1818_v17 = vpop.eup %1817 }
 0xda2   :  { %1501 = vrot.lane.b32.xlu2 %v1454_v10, %s1894_s6  ;;  %v1695_v14 = vmul.f32 -1.442695, %v1454_v10  ;;  %v1463_v27 = vadd.f32 1.0, %v1818_v17 }
 0xda4   :  { %1819 = vpow2.f32 %v1695_v14  ;;  %v1476_v54 = vand.u32 2147483648, %v1463_v27  ;;  %vm1470_vm15 = vweird.f32 %v1463_v27  ;;  %v1474_v45 = vand.u32 2147483647, %v1463_v27 }
 0xda5   :  { %1821 = vrcp.f32 %v1463_v27 }
 0xda6   :  { %v1477_v48 = vor.u32 1.1754944e-38, %v1476_v54  ;;  %vm1475_vm1 = vcmp.eq.f32.partialorder %v1474_v45, 8.507059e+37 }
 0xdaa   :  { %v1820_v43 = vpop.eup %1819 }
 0xdab   :  { %v1464_v33 = vadd.f32 1.0, %v1820_v43  ;;  %v1822_v41 = vpop.eup %1821 }
 0xdac   :  { %v1466_v15 = vmul.f32 %v1822_v41, %v1463_v27  ;;  %vm1471_vm12 = vweird.f32 %v1822_v41 }
 0xdad   :  { %1823 = vrcp.f32 %v1464_v33  ;;  %vm1472_vm0 = vmor %vm1470_vm15, %vm1471_vm12  ;;  %v1491_v0 = vand.u32 2147483648, %v1464_v33  ;;  %vm1485_vm3 = vweird.f32 %v1464_v33  ;;  %v1489_v49 = vand.u32 2147483647, %v1464_v33 }
 0xdae   :  { %v1467_v13 = vsub.f32 1.0, %v1466_v15 }
 0xdaf   :  { %v1492_v63 = vor.u32 1.1754944e-38, %v1491_v0  ;;  %vm1490_vm6 = vcmp.eq.f32.partialorder %v1489_v49, 8.507059e+37 }
 0xdb0   :  { %v1468_v28 = vmul.f32 %v1822_v41, %v1467_v13 }
 0xdb2   :  { %v1469_v38 = vadd.f32 %v1822_v41, %v1468_v28 }
 0xdb3   :  { %v1824_v22 = vpop.eup %1823 }
 0xdb4   :  { %v1481_v3 = vmul.f32 %v1824_v22, %v1464_v33  ;;  %v1473_v31 = vsel %vm1472_vm0, %v1822_v41, %v1469_v38  ;;  %vm1486_vm2 = vweird.f32 %v1824_v22 }
 0xdb5   :  { %v1478_v62 = vsel %vm1475_vm1, %v1477_v48, %v1473_v31  ;;  %vm1487_vm4 = vmor %vm1485_vm3, %vm1486_vm2 }
 0xdb6   :  { %v1482_v42 = vsub.f32 1.0, %v1481_v3  ;;  %v1495_v56 = vmul.f32 %v1478_v62, %v1451_v29 }
 0xdb8   :  { %v1483_v47 = vmul.f32 %v1824_v22, %v1482_v42 }
 0xdba   :  { %v1484_v44 = vadd.f32 %v1824_v22, %v1483_v47 }
 0xdbc   :  { %v1488_v58 = vsel %vm1487_vm4, %v1824_v22, %v1484_v44 }
 0xdbd   :  { %v1493_v2 = vsel %vm1490_vm6, %v1492_v63, %v1488_v58 }
 0xdbe   :  { %v1496_v60 = vmul.f32 %v1493_v2, %v1454_v10 }
 0xdfc   :  { %v1502_v59 = vpop.permute.xlu2 %1501 }
 0xdfd   :  { %v1506_v18 = vmul.f32 %v1502_v59, %v1496_v60 }
 0xe0b   :  { %v1500_v55 = vpop.permute.xlu1 %1499 }
 0xe0c   :  { %v1505_v1 = vmul.f32 %v1500_v55, %v1495_v56 }
 0xe0e   :  { %1696 = vmatmul.msk.f32.vlgmr.msrb.gmra.mxu0 %vm275_vm13, %v1505_v1 }
 0xe16   :  { %1697 = vmatmul.msk.f32.gmra.mxu0 %vm275_vm13, %v1506_v18 }
 0xe8b   :  { %v1530_v5 = vpop.f32.mrf.mxu0 }
 0xe8c   :  { %v1536_v23 = vadd.f32 %v1530_v5, %v2577_v4  ;;  %v200_v4 = vld [vmem:[%s2637_s13 + $0x10] sm:$0xff] }
 0xe8d   :  { %1591 = vmatpush.msrb.mxu2 %v200_v4 }
 0xe8e   :  { %v1538_v16 = vmul.f32 %v1536_v23, %v1536_v23 }
 0xe8f   :  { %1592 = vmatpush.msrb.mxu2 %v199_v36 }
 0xe90   :  { %v1540_v24 = vsel %vm204_vm5, %v1538_v16, 0.0 }
 0xe91   :  { %1541 = vadd.xlane.f32.xlu1 %v1540_v24 }
 0xe93   :  { %v1533_v25 = vpop.f32.mrf.mxu0 }
 0xe94   :  { %v1537_v26 = vadd.f32 %v1533_v25, %v2583_v9  ;;  %v198_v9 = vld [vmem:[%s2637_s13] sm:$0xff]  ;;  %s1895_s13 = smov [#allocation5]  }
 0xe95   :  { %1593 = vmatpush.msrb.mxu2 %v198_v9  ;;  %s1607_s0 = sshll.u32 %s1895_s13, 4  ;;  %s1608_s0 = int_to_ptr.vmem [resolvable:$true] %s1607_s0 }
 0xe96   :  { %v1539_v6 = vmul.f32 %v1537_v26, %v1537_v26 }
 0xe98   :  { %v1543_v19 = vsel %vm204_vm5, %v1539_v6, 0.0 }
 0xe99   :  { %1544 = vadd.xlane.f32.xlu2 %v1543_v19 }
 0xf04   :  { %v1542_v30 = vpop.xlane.xlu1 %1541 }
 0xf05   :  { %v1546_v37 = vmul.f32 %v1542_v30, %v2074_v52 }
 0xf07   :  { %v1548_v20 = vadd.f32 1e-06, %v1546_v37 }
 0xf09   :  { %1825 = vrsqrt.f32 %v1548_v20  ;;  %vm1556_vm14 = vweird.f32 %v1548_v20 }
 0xf0c   :  { %v1545_v11 = vpop.xlane.xlu2 %1544 }
 0xf0d   :  { %v1547_v35 = vmul.f32 %v1545_v11, %v2074_v52 }
 0xf0f   :  { %v1826_v7 = vpop.eup %1825  ;;  %v1549_v40 = vadd.f32 1e-06, %v1547_v35 }
 0xf10   :  { %v1551_v32 = vmul.f32 %v1826_v7, %v1548_v20  ;;  %vm1557_vm13 = vweird.f32 %v1826_v7 }
 0xf11   :  { %1827 = vrsqrt.f32 %v1549_v40  ;;  %vm1558_vm7 = vmor %vm1556_vm14, %vm1557_vm13  ;;  %vm1566_vm9 = vweird.f32 %v1549_v40 }
 0xf12   :  { %v1552_v53 = vmul.f32 %v1826_v7, %v1551_v32 }
 0xf14   :  { %v1553_v50 = vmul.f32 0.5, %v1552_v53 }
 0xf16   :  { %v1554_v34 = vsub.f32 1.5, %v1553_v50 }
 0xf17   :  { %v1828_v8 = vpop.eup %1827 }
 0xf18   :  { %v1555_v51 = vmul.f32 %v1826_v7, %v1554_v34  ;;  %v1561_v57 = vmul.f32 %v1828_v8, %v1549_v40  ;;  %vm1567_vm8 = vweird.f32 %v1828_v8 }
 0xf19   :  { %vm1568_vm10 = vmor %vm1566_vm9, %vm1567_vm8 }
 0xf1a   :  { %v1559_v46 = vsel %vm1558_vm7, %v1826_v7, %v1555_v51  ;;  %v1562_v61 = vmul.f32 %v1828_v8, %v1561_v57 }
 0xf1b   :  { %v1570_v39 = vmul.f32 %v1559_v46, %v1536_v23 }
 0xf1c   :  { %v1563_v29 = vmul.f32 0.5, %v1562_v61 }
 0xf1d   :  { %1698 = vmatmul.msk.f32.vlgmr.msrb.gmra.mxu2 %vm204_vm5, %v1570_v39 }
 0xf1e   :  { %v1564_v52 = vsub.f32 1.5, %v1563_v29 }
 0xf20   :  { %v1565_v10 = vmul.f32 %v1828_v8, %v1564_v52 }
 0xf22   :  { %v1569_v12 = vsel %vm1568_vm10, %v1828_v8, %v1565_v10 }
 0xf23   :  { %v1571_v14 = vmul.f32 %v1569_v12, %v1537_v26 }
 0xf25   :  { %1699 = vmatmul.msk.f32.gmra.mxu2 %vm204_vm5, %v1571_v14 }
 0xfa0   :  { %v1595_v17 = vpop.f32.mrf.mxu2 }
 0xfa1   :  { %1601 = vst [vmem:[#allocation5] sm:$0xff] %v1595_v17 }
 0xfa8   :  { %v1598_v27 = vpop.f32.mrf.mxu2 }
 0xfa9   :  { %1602 = vst [vmem:[#allocation5 + $0x8] sm:$0xff] %v1598_v27 }
 0xfaa   :  { %1615 = dma.vmem_to_hbm [thread:$0]  %s1608_s0, 256, %s1610_s3, [#allocation4], %s1886_s18, %s1886_s18, %s1887_s19  }
 0xfab   :  { %1883 = dma.done.wait [#allocation4], 256  }
 0xfac   :  { %1884 = vsyncadd [#allocation4], 4294967040 }
 0xfad   :  { %1620 = vsyncpa [#allocation3], 1 }
 0xfae   :  { %1621 = vsyncpa [#allocation4], 1 }

</bundles_post_ra>
